<compile_context>
chip_gen: v7x
topology: tpu7x:2x2x1
jax: 0.10.0
libtpu: 0.0.40
codegen_flags: <defaults>
</compile_context>

<pallas_src>
import functools

import jax
import jax.numpy as jnp
from jax.experimental import pallas as pl
from jax.experimental.pallas import tpu as pltpu


IN_CH = 3
STEM_CH = 40            # efficientnet_b3 stem width
STEM_PAD = 128          # pad stem width 40 -> 128 (lane / MXU dense)
K_STEM = 9 * IN_CH      # 27 im2col features
K_STEM_PAD = 32         # pad contraction 27 -> 32 (sublane aligned)
HEAD_FEATURES = 1536    # efficientnet_b3 classifier.in_features
OUT_FEATURES = 2
OUT_PAD = 128           # pad classifier out 2 -> 128 (unmasked lane-dense stores)
OUT_SUBLANES = 8        # output tile sublane depth


def _round_up(x, m):
    return ((x + m - 1) // m) * m


@functools.lru_cache(maxsize=None)
def _tpu_config():
    """Per-generation spatial tile cap, VMEM limit, and epilogue dtype choice."""
    try:
        kind = jax.devices()[0].device_kind.lower()
    except Exception:  # pragma: no cover - fall back to v6e-style defaults
        kind = ""
    if "v7" in kind:
        # 64 MiB VMEM per TensorCore: cap tile at 1024, keep scoped VMEM <= 48 MiB.
        return dict(max_tile=1024, vmem_bytes=48 * 1024 * 1024, bf16_epilogue=True)
    if any(t in kind for t in ("v2", "v3", "v4", "v5")):
        # No bf16 VPU/EUP on v5e and older: keep f32 epilogue; 128 MiB VMEM -> big tiles.
        return dict(max_tile=2048, vmem_bytes=64 * 1024 * 1024, bf16_epilogue=False)
    # v6e (default): bf16 VPU/EUP, 128 MiB VMEM.
    return dict(max_tile=2048, vmem_bytes=64 * 1024 * 1024, bf16_epilogue=True)


# ----------------------------------------------------------------------------
# Fused Pallas kernel: stem conv + head 1x1 conv + global-avg-pool + classifier
# ----------------------------------------------------------------------------
def _fused_forward_kernel(cols_ref, w_stem_ref, b_stem_ref,
                          w_head_ref, b_head_ref,
                          w_cls_ref, b_cls_ref,
                          out_ref, acc_ref,
                          *, inv_hw, hw, tile_hw, ep_dtype):
    s = pl.program_id(1)

    @pl.when(s == 0)
    def _init():
        acc_ref[...] = jnp.zeros_like(acc_ref)

    x = cols_ref[0]                                      # (TILE_HW, 32) bf16

    # stem: 3x3 s2 conv (im2col GEMM, BN folded) + SiLU.  MXU accumulates f32;
    # bias + SiLU run in ep_dtype (bf16 on v6e/v7x, f32 on v5e).
    h = jnp.dot(x, w_stem_ref[...], preferred_element_type=jnp.float32)
    h = h.astype(ep_dtype) + b_stem_ref[...]
    h = h * jax.nn.sigmoid(h)

    # head: 1x1 conv to 1536 features (BN folded) + SiLU; bf16 MXU operands, f32
    # accumulate, epilogue in ep_dtype (halves VPU/EUP work + f temporary on v6e/v7x).
    f = jnp.dot(h.astype(jnp.bfloat16), w_head_ref[...],
                preferred_element_type=jnp.float32)
    f = f.astype(ep_dtype) + b_head_ref[...]
    f = f * jax.nn.sigmoid(f)

    # Global-average-pool partial sum on the MXU (vector-extended slot has slack;
    # keeps the saturated VPU/XLU path free).  The masked ones-row zeroes any
    # spatial-padding rows of the final tile so inv_hw stays 1/real_HW.
    valid = hw - s * tile_hw
    ones = (jax.lax.broadcasted_iota(jnp.int32, (OUT_SUBLANES, tile_hw), 1)
            < valid).astype(f.dtype)
    acc_ref[...] += jnp.dot(ones, f, preferred_element_type=jnp.float32)

    @pl.when(s == pl.num_programs(1) - 1)
    def _finalize():
        # All 8 accumulator rows are identical -> already the 8-sublane broadcast.
        pooled = (acc_ref[...] * inv_hw).astype(jnp.bfloat16)       # (8, 1536)
        logits = jnp.dot(pooled, w_cls_ref[...],
                         preferred_element_type=jnp.float32) + b_cls_ref[...]
        out_ref[0] = logits.astype(out_ref.dtype)                   # (8, 128) lane-dense


def fused_forward(cols, params, *, n, hw):
    cfg = _tpu_config()
    ep_dtype = jnp.bfloat16 if cfg["bf16_epilogue"] else jnp.float32

    # Fixed per-generation tile; pad HW up to a multiple of it (padded rows are
    # masked inside the kernel before the pool accumulate).
    tile_hw = min(_round_up(hw, 8), cfg["max_tile"])
    padded_hw = _round_up(hw, tile_hw)
    if padded_hw != hw:
        cols = jnp.pad(cols, ((0, 0), (0, padded_hw - hw), (0, 0)))
    grid = (n, padded_hw // tile_hw)

    b_stem = params["b_stem"].astype(ep_dtype)
    b_head = params["b_head"].astype(ep_dtype)

    flops = (2 * n * padded_hw * (K_STEM_PAD * STEM_PAD
                                  + STEM_PAD * HEAD_FEATURES
                                  + OUT_SUBLANES * HEAD_FEATURES)
             + 2 * n * OUT_SUBLANES * HEAD_FEATURES * OUT_PAD)
    transcendentals = n * padded_hw * (STEM_PAD + HEAD_FEATURES)
    bytes_accessed = int(cols.size) * cols.dtype.itemsize
    bytes_accessed += sum(int(v.size) * v.dtype.itemsize for v in params.values())
    bytes_accessed += n * OUT_SUBLANES * OUT_PAD * 4

    kernel = functools.partial(_fused_forward_kernel,
                               inv_hw=1.0 / hw, hw=hw, tile_hw=tile_hw,
                               ep_dtype=ep_dtype)
    out = pl.pallas_call(
        kernel,
        out_shape=jax.ShapeDtypeStruct((n, OUT_SUBLANES, OUT_PAD), jnp.float32),
        grid_spec=pltpu.PrefetchScalarGridSpec(
            num_scalar_prefetch=0,
            grid=grid,
            in_specs=[
                # activations: tiled over (batch, spatial)
                pl.BlockSpec((1, tile_hw, K_STEM_PAD), lambda b, s: (b, s, 0)),
                # weights/biases: full blocks, resident in VMEM across the grid
                pl.BlockSpec((K_STEM_PAD, STEM_PAD), lambda b, s: (0, 0)),
                pl.BlockSpec((1, STEM_PAD), lambda b, s: (0, 0)),
                pl.BlockSpec((STEM_PAD, HEAD_FEATURES), lambda b, s: (0, 0)),
                pl.BlockSpec((1, HEAD_FEATURES), lambda b, s: (0, 0)),
                pl.BlockSpec((HEAD_FEATURES, OUT_PAD), lambda b, s: (0, 0)),
                pl.BlockSpec((1, OUT_PAD), lambda b, s: (0, 0)),
            ],
            out_specs=pl.BlockSpec((1, OUT_SUBLANES, OUT_PAD), lambda b, s: (b, 0, 0)),
            scratch_shapes=[pltpu.VMEM((OUT_SUBLANES, HEAD_FEATURES), jnp.float32)],
        ),
        compiler_params=pltpu.CompilerParams(
            # batch axis -> megacore parallel; spatial axis is a reduction
            dimension_semantics=("parallel", "arbitrary"),
            vmem_limit_bytes=cfg["vmem_bytes"],
        ),
        cost_estimate=pl.CostEstimate(
            flops=flops,
            transcendentals=transcendentals,
            bytes_accessed=bytes_accessed),
    )(cols, params["w_stem"], b_stem,
      params["w_head"], b_head,
      params["w_cls"], params["b_cls"])
    return out[:, 0, :OUT_FEATURES]


# ----------------------------------------------------------------------------
# Glue: im2col for the 3x3 stride-2 stem conv (padding=1), K padded 27 -> 32
# ----------------------------------------------------------------------------
def im2col_3x3_s2(x_nhwc):
    n, h, w, c = x_nhwc.shape
    xp = jnp.pad(x_nhwc, ((0, 0), (1, 1), (1, 1), (0, 0)))
    # PyTorch Conv2d(k=3, s=2, p=1): out = floor((H-1)/2) + 1  (handles odd H/W)
    ho, wo = (h - 1) // 2 + 1, (w - 1) // 2 + 1
    cols = []
    for dh in range(3):
        for dw in range(3):
            cols.append(xp[:, dh:dh + 2 * ho:2, dw:dw + 2 * wo:2, :])
    cols = jnp.concatenate(cols, axis=-1).reshape(n, ho * wo, 9 * c)  # (kh,kw,c) order
    cols = jnp.pad(cols, ((0, 0), (0, 0), (0, K_STEM_PAD - 9 * c)))
    return cols.astype(jnp.bfloat16), ho, wo


# ----------------------------------------------------------------------------
# Parameters (deterministic synthetic weights, padded to MXU/lane-dense shapes)
# ----------------------------------------------------------------------------
def init_params(key):
    k1, k2, k3, k4, k5, k6 = jax.random.split(key, 6)

    # Stem 3x3 conv (HWIO, BN folded), padded K 27->32, out 40->128.
    w_stem = jnp.zeros((K_STEM_PAD, STEM_PAD), jnp.float32)
    w_real = jax.random.normal(k1, (3, 3, IN_CH, STEM_CH), jnp.float32) * 0.1
    w_stem = w_stem.at[:K_STEM, :STEM_CH].set(w_real.reshape(K_STEM, STEM_CH))
    b_stem = jnp.zeros((1, STEM_PAD), jnp.float32)
    b_stem = b_stem.at[:, :STEM_CH].set(
        jax.random.normal(k2, (1, STEM_CH), jnp.float32) * 0.01)

    # Head 1x1 conv to 1536 (BN folded), padded in 40->128 (extra rows are zero).
    w_head = jnp.zeros((STEM_PAD, HEAD_FEATURES), jnp.float32)
    w_head = w_head.at[:STEM_CH, :].set(
        jax.random.normal(k3, (STEM_CH, HEAD_FEATURES), jnp.float32) * 0.05)
    b_head = jax.random.normal(k4, (1, HEAD_FEATURES), jnp.float32) * 0.01

    # Replaced classifier nn.Linear(1536, 2), padded out 2->128.
    w_cls = jnp.zeros((HEAD_FEATURES, OUT_PAD), jnp.float32)
    w_cls = w_cls.at[:, :OUT_FEATURES].set(
        jax.random.normal(k5, (HEAD_FEATURES, OUT_FEATURES), jnp.float32) * 0.02)
    b_cls = jnp.zeros((1, OUT_PAD), jnp.float32)
    b_cls = b_cls.at[:, :OUT_FEATURES].set(
        jax.random.normal(k6, (1, OUT_FEATURES), jnp.float32) * 0.01)

    return dict(
        w_stem=w_stem.astype(jnp.bfloat16),   # bf16 matmul operands, f32 accumulation
        b_stem=b_stem,
        w_head=w_head.astype(jnp.bfloat16),
        b_head=b_head,
        w_cls=w_cls.astype(jnp.bfloat16),
        b_cls=b_cls,
    )


# ----------------------------------------------------------------------------
# Forward pass of myModel
# ----------------------------------------------------------------------------
@jax.jit
def my_model_forward(x_nchw, params):
    # PyTorch NCHW -> NHWC (channels -> lanes) for the kernel.
    x = jnp.transpose(x_nchw, (0, 2, 3, 1)).astype(jnp.float32)
    n = x.shape[0]
    cols, ho, wo = im2col_3x3_s2(x)            # (N, HW, 32) bf16
    # TODO(synk): efficientnet_b3 MBConv block stack not implemented.
    return fused_forward(cols, params, n=n, hw=ho * wo)   # (N, 2)


if __name__ == "__main__":
    key = jax.random.PRNGKey(0)
    k_x, k_p = jax.random.split(key)
    # Small input consistent with the module's image-classifier forward (NCHW).
    x = jax.random.normal(k_x, (2, 3, 16, 16), jnp.float32)
    params = init_params(k_p)

    out = my_model_forward(x, params)
    out = jax.block_until_ready(out)
    assert out.shape == (2, OUT_FEATURES), out.shape
    assert bool(jnp.all(jnp.isfinite(out)))
    print("KERNEL_OK")
</pallas_src>

<mosaic_0001>
module attributes {stable_mosaic.version = 11 : i64} {
  func.func @_fused_forward_kernel(%arg0: i32, %arg1: i32, %arg2: memref<1x64x32xbf16, #tpu.memory_space<vmem>>, %arg3: memref<32x128xbf16, #tpu.memory_space<vmem>>, %arg4: memref<1x128xbf16, #tpu.memory_space<vmem>>, %arg5: memref<128x1536xbf16, #tpu.memory_space<vmem>>, %arg6: memref<1x1536xbf16, #tpu.memory_space<vmem>>, %arg7: memref<1536x128xbf16, #tpu.memory_space<vmem>>, %arg8: memref<1x128xf32, #tpu.memory_space<vmem>>, %arg9: memref<1x8x128xf32, #tpu.memory_space<vmem>>, %arg10: memref<8x1536xf32, #tpu.memory_space<vmem>>) attributes {dimension_semantics = [#tpu.dimension_semantics<parallel>, #tpu.dimension_semantics<arbitrary>], iteration_bounds = array<i64: 2, 1>, scalar_prefetch = 0 : i64, scratch_operands = 1 : i64, tpu.core_type = #tpu.core_type<tc>, window_params = [{transform_indices = @transform_0, window_bounds = array<i64: 1, 64, 32>}, {pipeline_mode = #tpu.pipeline_mode<synchronous>, transform_indices = @transform_1, window_bounds = array<i64: 32, 128>}, {pipeline_mode = #tpu.pipeline_mode<synchronous>, transform_indices = @transform_2, window_bounds = array<i64: 1, 128>}, {pipeline_mode = #tpu.pipeline_mode<synchronous>, transform_indices = @transform_3, window_bounds = array<i64: 128, 1536>}, {pipeline_mode = #tpu.pipeline_mode<synchronous>, transform_indices = @transform_4, window_bounds = array<i64: 1, 1536>}, {pipeline_mode = #tpu.pipeline_mode<synchronous>, transform_indices = @transform_5, window_bounds = array<i64: 1536, 128>}, {pipeline_mode = #tpu.pipeline_mode<synchronous>, transform_indices = @transform_6, window_bounds = array<i64: 1, 128>}, {transform_indices = @transform_7, window_bounds = array<i64: 1, 8, 128>}]} {
    %c0_i32 = arith.constant 0 : i32
    %0 = arith.cmpi eq, %arg1, %c0_i32 : i32
    %1 = arith.extui %0 : i1 to i32
    %c0_i32_0 = arith.constant 0 : i32
    %2 = arith.cmpi ne, %1, %c0_i32_0 : i32
    scf.if %2 {
      %cst_22 = arith.constant 0.000000e+00 : f32
      %44 = vector.broadcast %cst_22 : f32 to vector<8x1536xf32>
      %c0_23 = arith.constant 0 : index
      %c0_24 = arith.constant 0 : index
      %45 = vector.load %arg10[%c0_23, %c0_24] : memref<8x1536xf32, #tpu.memory_space<vmem>>, vector<8x1536xf32>
      tpu.vector_store %arg10[%c0_23, %c0_24], %44 {strides = array<i32>} : memref<8x1536xf32, #tpu.memory_space<vmem>>, vector<8x1536xf32>,
    } else {
    }
    %c0 = arith.constant 0 : index
    %c0_1 = arith.constant 0 : index
    %c0_2 = arith.constant 0 : index
    %3 = vector.load %arg2[%c0, %c0_1, %c0_2] : memref<1x64x32xbf16, #tpu.memory_space<vmem>>, vector<1x64x32xbf16>
    %4 = vector.shape_cast %3 : vector<1x64x32xbf16> to vector<64x32xbf16>
    %c0_3 = arith.constant 0 : index
    %c0_4 = arith.constant 0 : index
    %5 = vector.load %arg3[%c0_3, %c0_4] : memref<32x128xbf16, #tpu.memory_space<vmem>>, vector<32x128xbf16>
    %cst = arith.constant dense<0.000000e+00> : vector<64x128xf32>
    %6 = tpu.matmul %4, %5, %cst {dimension_numbers = #tpu.dot_dimension_numbers<[1], [0], [0], [1], [0, 0, 1, 1], [], []>} : vector<64x32xbf16>, vector<32x128xbf16>, vector<64x128xf32> -> vector<64x128xf32>
    %7 = arith.truncf %6 : vector<64x128xf32> to vector<64x128xbf16>
    %c0_5 = arith.constant 0 : index
    %c0_6 = arith.constant 0 : index
    %8 = vector.load %arg4[%c0_5, %c0_6] : memref<1x128xbf16, #tpu.memory_space<vmem>>, vector<1x128xbf16>
    %9 = vector.broadcast %8 : vector<1x128xbf16> to vector<64x128xbf16>
    %10 = arith.addf %7, %9 : vector<64x128xbf16>
    %11 = arith.negf %10 : vector<64x128xbf16>
    %12 = math.exp %11 : vector<64x128xbf16>
    %cst_7 = arith.constant 1.000000e+00 : bf16
    %13 = vector.broadcast %cst_7 : bf16 to vector<64x128xbf16>
    %14 = arith.addf %13, %12 : vector<64x128xbf16>
    %15 = arith.divf %13, %14 : vector<64x128xbf16>
    %16 = arith.mulf %10, %15 : vector<64x128xbf16>
    %c0_8 = arith.constant 0 : index
    %c0_9 = arith.constant 0 : index
    %17 = vector.load %arg5[%c0_8, %c0_9] : memref<128x1536xbf16, #tpu.memory_space<vmem>>, vector<128x1536xbf16>
    %cst_10 = arith.constant dense<0.000000e+00> : vector<64x1536xf32>
    %18 = tpu.matmul %16, %17, %cst_10 {dimension_numbers = #tpu.dot_dimension_numbers<[1], [0], [0], [1], [0, 0, 1, 1], [], []>} : vector<64x128xbf16>, vector<128x1536xbf16>, vector<64x1536xf32> -> vector<64x1536xf32>
    %19 = arith.truncf %18 : vector<64x1536xf32> to vector<64x1536xbf16>
    %c0_11 = arith.constant 0 : index
    %c0_12 = arith.constant 0 : index
    %20 = vector.load %arg6[%c0_11, %c0_12] : memref<1x1536xbf16, #tpu.memory_space<vmem>>, vector<1x1536xbf16>
    %21 = vector.broadcast %20 : vector<1x1536xbf16> to vector<64x1536xbf16>
    %22 = arith.addf %19, %21 : vector<64x1536xbf16>
    %23 = arith.negf %22 : vector<64x1536xbf16>
    %24 = math.exp %23 : vector<64x1536xbf16>
    %cst_13 = arith.constant 1.000000e+00 : bf16
    %25 = vector.broadcast %cst_13 : bf16 to vector<64x1536xbf16>
    %26 = arith.addf %25, %24 : vector<64x1536xbf16>
    %27 = arith.divf %25, %26 : vector<64x1536xbf16>
    %28 = arith.mulf %22, %27 : vector<64x1536xbf16>
    %c64_i32 = arith.constant 64 : i32
    %29 = arith.muli %arg1, %c64_i32 : i32
    %c64_i32_14 = arith.constant 64 : i32
    %30 = arith.subi %c64_i32_14, %29 : i32
    %31 = tpu.iota {dimensions = array<i32: 1>} : vector<8x64xi32>
    %32 = vector.broadcast %30 : i32 to vector<8x64xi32>
    %33 = arith.cmpi slt, %31, %32 : vector<8x64xi32>
    %34 = arith.extui %33 : vector<8x64xi1> to vector<8x64xi32>
    %35 = arith.sitofp %34 : vector<8x64xi32> to vector<8x64xf32>
    %36 = arith.truncf %35 : vector<8x64xf32> to vector<8x64xbf16>
    %c0_15 = arith.constant 0 : index
    %c0_16 = arith.constant 0 : index
    %37 = vector.load %arg10[%c0_15, %c0_16] : memref<8x1536xf32, #tpu.memory_space<vmem>>, vector<8x1536xf32>
    %cst_17 = arith.constant dense<0.000000e+00> : vector<8x1536xf32>
    %38 = tpu.matmul %36, %28, %cst_17 {dimension_numbers = #tpu.dot_dimension_numbers<[1], [0], [0], [1], [0, 0, 1, 1], [], []>} : vector<8x64xbf16>, vector<64x1536xbf16>, vector<8x1536xf32> -> vector<8x1536xf32>
    %39 = arith.addf %37, %38 : vector<8x1536xf32>
    %c0_18 = arith.constant 0 : index
    %c0_19 = arith.constant 0 : index
    %40 = vector.load %arg10[%c0_18, %c0_19] : memref<8x1536xf32, #tpu.memory_space<vmem>>, vector<8x1536xf32>
    tpu.vector_store %arg10[%c0_18, %c0_19], %39 {strides = array<i32>} : memref<8x1536xf32, #tpu.memory_space<vmem>>, vector<8x1536xf32>,
    %c0_i32_20 = arith.constant 0 : i32
    %41 = arith.cmpi eq, %arg1, %c0_i32_20 : i32
    %42 = arith.extui %41 : i1 to i32
    %c0_i32_21 = arith.constant 0 : i32
    %43 = arith.cmpi ne, %42, %c0_i32_21 : i32
    scf.if %43 {
      %c0_22 = arith.constant 0 : index
      %c0_23 = arith.constant 0 : index
      %44 = vector.load %arg10[%c0_22, %c0_23] : memref<8x1536xf32, #tpu.memory_space<vmem>>, vector<8x1536xf32>
      %cst_24 = arith.constant 1.562500e-02 : f32
      %45 = vector.broadcast %cst_24 : f32 to vector<8x1536xf32>
      %46 = arith.mulf %44, %45 : vector<8x1536xf32>
      %47 = arith.truncf %46 : vector<8x1536xf32> to vector<8x1536xbf16>
      %c0_25 = arith.constant 0 : index
      %c0_26 = arith.constant 0 : index
      %48 = vector.load %arg7[%c0_25, %c0_26] : memref<1536x128xbf16, #tpu.memory_space<vmem>>, vector<1536x128xbf16>
      %cst_27 = arith.constant dense<0.000000e+00> : vector<8x128xf32>
      %49 = tpu.matmul %47, %48, %cst_27 {dimension_numbers = #tpu.dot_dimension_numbers<[1], [0], [0], [1], [0, 0, 1, 1], [], []>} : vector<8x1536xbf16>, vector<1536x128xbf16>, vector<8x128xf32> -> vector<8x128xf32>
      %c0_28 = arith.constant 0 : index
      %c0_29 = arith.constant 0 : index
      %50 = vector.load %arg8[%c0_28, %c0_29] : memref<1x128xf32, #tpu.memory_space<vmem>>, vector<1x128xf32>
      %51 = vector.broadcast %50 : vector<1x128xf32> to vector<8x128xf32>
      %52 = arith.addf %49, %51 : vector<8x128xf32>
      %c0_30 = arith.constant 0 : index
      %c0_31 = arith.constant 0 : index
      %c0_32 = arith.constant 0 : index
      %53 = vector.load %arg9[%c0_30, %c0_31, %c0_32] : memref<1x8x128xf32, #tpu.memory_space<vmem>>, vector<1x8x128xf32>
      %54 = vector.shape_cast %53 : vector<1x8x128xf32> to vector<8x128xf32>
      %55 = vector.shape_cast %52 : vector<8x128xf32> to vector<1x8x128xf32>
      tpu.vector_store %arg9[%c0_30, %c0_31, %c0_32], %55 {strides = array<i32>} : memref<1x8x128xf32, #tpu.memory_space<vmem>>, vector<1x8x128xf32>,
    } else {
    }
    return
  }
  func.func @transform_0(%arg0: i32, %arg1: i32) -> (i32, i32, i32) {
    %c0_i32 = arith.constant 0 : i32
    %c0_i32_0 = arith.constant 0 : i32
    return %arg0, %arg1, %c0_i32 : i32, i32, i32
  }
  func.func @transform_1(%arg0: i32, %arg1: i32) -> (i32, i32) {
    %c0_i32 = arith.constant 0 : i32
    %c0_i32_0 = arith.constant 0 : i32
    %c0_i32_1 = arith.constant 0 : i32
    return %c0_i32, %c0_i32_0 : i32, i32
  }
  func.func @transform_2(%arg0: i32, %arg1: i32) -> (i32, i32) {
    %c0_i32 = arith.constant 0 : i32
    %c0_i32_0 = arith.constant 0 : i32
    %c0_i32_1 = arith.constant 0 : i32
    return %c0_i32, %c0_i32_0 : i32, i32
  }
  func.func @transform_3(%arg0: i32, %arg1: i32) -> (i32, i32) {
    %c0_i32 = arith.constant 0 : i32
    %c0_i32_0 = arith.constant 0 : i32
    %c0_i32_1 = arith.constant 0 : i32
    return %c0_i32, %c0_i32_0 : i32, i32
  }
  func.func @transform_4(%arg0: i32, %arg1: i32) -> (i32, i32) {
    %c0_i32 = arith.constant 0 : i32
    %c0_i32_0 = arith.constant 0 : i32
    %c0_i32_1 = arith.constant 0 : i32
    return %c0_i32, %c0_i32_0 : i32, i32
  }
  func.func @transform_5(%arg0: i32, %arg1: i32) -> (i32, i32) {
    %c0_i32 = arith.constant 0 : i32
    %c0_i32_0 = arith.constant 0 : i32
    %c0_i32_1 = arith.constant 0 : i32
    return %c0_i32, %c0_i32_0 : i32, i32
  }
  func.func @transform_6(%arg0: i32, %arg1: i32) -> (i32, i32) {
    %c0_i32 = arith.constant 0 : i32
    %c0_i32_0 = arith.constant 0 : i32
    %c0_i32_1 = arith.constant 0 : i32
    return %c0_i32, %c0_i32_0 : i32, i32
  }
  func.func @transform_7(%arg0: i32, %arg1: i32) -> (i32, i32, i32) {
    %c0_i32 = arith.constant 0 : i32
    %c0_i32_0 = arith.constant 0 : i32
    %c0_i32_1 = arith.constant 0 : i32
    return %arg0, %c0_i32, %c0_i32_0 : i32, i32, i32
  }
}

</mosaic_0001>

<bundles_post_ra>
// kernel: my_model_forward.1
= control target key start
LH: loop header
LB: loop body
LE: loop exit
PB: predicated region body
PF: predicated region fallthrough
CT: control target
= control target key end

     0   :  { %s5904_s0 = inlined_call_operand.hbm [shape: bf16[2,64,32], index: 0, kind: input, shape index: {}]   ;;  %s5905_s1 = inlined_call_operand.hbm [shape: bf16[32,128], index: 1, kind: input, shape index: {}]   ;;  %s5906_s2 = inlined_call_operand.hbm [shape: bf16[1,128], index: 2, kind: input, shape index: {}]   ;;  %s5907_s3 = inlined_call_operand.hbm [shape: bf16[128,1536], index: 3, kind: input, shape index: {}]   ;;  %s5908_s4 = inlined_call_operand.hbm [shape: bf16[1,1536], index: 4, kind: input, shape index: {}]   ;;  %s5909_s5 = inlined_call_operand.hbm [shape: bf16[1536,128], index: 5, kind: input, shape index: {}]   ;;  %s5910_s6 = inlined_call_operand.hbm [shape: f32[1,128], index: 6, kind: input, shape index: {}]   ;;  %s5911_s7 = inlined_call_operand.hbm [shape: f32[2,8,128], index: 7, kind: output, shape index: {}]  }
   0x1   :  { %5921 = sst [smem:[#allocation21_spill]] %s5905_s1 }
   0x2   :  { %5922 = sst [smem:[#allocation22_spill]] %s5906_s2 }
   0x3   :  { %5923 = sst [smem:[#allocation23_spill]] %s5907_s3 }
   0x4   :  { %12 = vsyncpa [#allocation4], 0 }
   0x5   :  { %14 = vsyncpa [#allocation4 + $0x1], 0 }
   0x6   :  { %15 = vsyncpa [#allocation7], 0 }
   0x7   :  { %16 = vsyncpa [#allocation10], 0 }
   0x8   :  { %17 = vsyncpa [#allocation13], 0 }
   0x9   :  { %18 = vsyncpa [#allocation5], 0 }
   0xa   :  { %20 = vsyncpa [#allocation5 + $0x1], 0  ;;  %s5114_s24 = smov 0   ;;  %s5116_s25 = smov 0  }
   0xb   :  { %s5118_s26 = smov 0   ;;  %s5120_s27 = smov 0  }
   0xc   :  { %s5122_s28 = smov 0   ;;  %s5124_s29 = smov 0  }
   0xd LB: > { %s5912_s30 = sadd.s32 4294967295, %s5057_s29   ;;  %p3742_p0 = scmp.ge.s32.totalorder %s5057_s29, 1  ;;  %s5057_s29 = sphi %s5124_s29, %s26_s29   ;;  %s5053_s28 = sphi %s5122_s28, %s5949_s28   ;;  %s5049_s27 = sphi %s5120_s27, %s5948_s27   ;;  %s5045_s26 = sphi %s5118_s26, %s5947_s26   ;;  %s5041_s25 = sphi %s5116_s25, %s5946_s25   ;;  %s5037_s24 = sphi %s5114_s24, %s5945_s24  }
   0xe   : > { %p5148_p1 = scmp.eq.s32.totalorder %s5912_s30, 0  ;;  %p223_p2 = scmp.lt.s32.totalorder %s5057_s29, 3 }
   0xf   : > { %s5059_s10 = smov [#allocation6]   ;;  %s5060_s13 = smov [#allocation9]  }
  0x10   : > { %s5924_s8 = scalar_select %p5148_p1, 1, 0 }
  0x11   : > { %p5153_p3 = pnand %p3742_p0, %p223_p2  ;;  %s235_s11 = sshll.u32 %s5059_s10, 4  ;;  %s5157_s11 = int_to_ptr.vmem [resolvable:$true] %s235_s11 }
  0x12   : > { %s259_s14 = sshll.u32 %s5060_s13, 4  ;;  %s5927_s1 = sld [smem:[#allocation21_spill]]  ;;  %s5168_s14 = int_to_ptr.vmem [resolvable:$true] %s259_s14 }
  0x13   : > { %s5925_s9 = scalar_select %p5153_p3, 1, 0 }
  0x14   : > { %p4208_p4 = pneg %p5153_p3 }
  0x16   : > { %p5164_p6 = pnand %p4208_p4, %p5148_p1 }
  0x18   : > { %s4765_s17 = scalar_lea.hbm %s5927_s1, 256  ;;  %p5178_p8 = pneg %p5164_p6 }
  0x19   : > { %p4766_p7 = scmp.ne.s32.totalorder %s5927_s1, %s4765_s17  ;;  %p4772_p11 = scmp.lt.u32.totalorder %s4765_s17, %s5927_s1 }
  0x1b   : > { %p4768_p9 = pnand %p5178_p8, %p4766_p7 }
  0x1d   : > { %p4769_p10 = pneg %p4768_p9 }
  0x1f   : > { %p4774_p12 = pnand %p4772_p11, %p4769_p10 }
  0x21   : > { %4777 = shalt.err (!%p4774_p12)
}
  0x22   : > { %s4778_s23 = scalar_lea.vmem %s5157_s11, 256  ;;  %p4786_p4 = scmp.lt.s32.totalorder %s5157_s11, %s5157_s11 }
  0x23   : > { %p4779_p13 = scmp.ne.s32.totalorder %s5157_s11, %s4778_s23  ;;  %p4787_p5 = scmp.lt.s32.totalorder %s4778_s23, %s4778_s23 }
  0x25   : > { %p4781_p0 = pnand %p4779_p13, %p5178_p8  ;;  %p4788_p7 = por %p4787_p5, %p4786_p4 }
  0x27   : > { %p4782_p2 = pneg %p4781_p0 }
  0x29   : > { %p4789_p9 = pnand %p4788_p7, %p4782_p2 }
  0x2b   : > { %4792 = shalt.err (!%p4789_p9)
}
  0x2c   : > { %s5913_s10 = smov 64   ;;  %s5915_s13 = smov 4  }
  0x2d   : > { %4211 = dma.hbm_to_vmem [thread:$0]  (!%p5164_p6), %s5927_s1, 256, %s5157_s11, [#allocation7], %s5913_s10, %s5913_s10, %s5915_s13  }
  0x2e   : > { %s5929_s3 = sld [smem:[#allocation23_spill]] }
  0x34   : > { %s4793_s19 = scalar_lea.hbm %s5929_s3, 12288 }
  0x35   : > { %p4794_p5 = scmp.ne.s32.totalorder %s5929_s3, %s4793_s19  ;;  %p4800_p12 = scmp.lt.u32.totalorder %s4793_s19, %s5929_s3 }
  0x37   : > { %p4796_p10 = pnand %p4794_p5, %p5178_p8 }
  0x39   : > { %p4797_p11 = pneg %p4796_p10 }
  0x3b   : > { %p4802_p13 = pnand %p4800_p12, %p4797_p11 }
  0x3d   : > { %4805 = shalt.err (!%p4802_p13)
}
  0x3e   : > { %s4806_s11 = scalar_lea.vmem %s5168_s14, 12288  ;;  %p4814_p7 = scmp.lt.s32.totalorder %s5168_s14, %s5168_s14 }
  0x3f   : > { %p4807_p0 = scmp.ne.s32.totalorder %s5168_s14, %s4806_s11  ;;  %p4815_p9 = scmp.lt.s32.totalorder %s4806_s11, %s4806_s11 }
  0x41   : > { %p4809_p2 = pnand %p4807_p0, %p5178_p8  ;;  %p4816_p5 = por %p4815_p9, %p4814_p7 }
  0x43   : > { %p4810_p4 = pneg %p4809_p2 }
  0x45   : > { %p4817_p10 = pnand %p4816_p5, %p4810_p4 }
  0x47   : > { %4820 = shalt.err (!%p4817_p10)
}
  0x48   : > { %s5063_s15 = smov 768   ;;  %s5064_s30 = smov 48  }
  0x49   : > { %4217 = dma.hbm_to_vmem [thread:$0]  (!%p5164_p6), %s5929_s3, 12288, %s5168_s14, [#allocation10], %s5063_s15, %s5063_s15, %s5064_s30  }
  0x4a   : > { %s5065_s18 = smov [#allocation12]   ;;  %s5066_s21 = smov [#allocation8]  }
  0x4b   : > { %s283_s19 = sshll.u32 %s5065_s18, 4  ;;  %s249_s22 = sshll.u32 %s5066_s21, 4  ;;  %s284_s19 = int_to_ptr.vmem [resolvable:$true] %s283_s19  ;;  %s5225_s22 = int_to_ptr.vmem [resolvable:$true] %s249_s22 }
  0x4c   : > { %s4821_s10 = scalar_lea.hbm %s5909_s5, 12288 }
  0x4d   : > { %p4822_p11 = scmp.ne.s32.totalorder %s5909_s5, %s4821_s10  ;;  %p4828_p0 = scmp.lt.u32.totalorder %s4821_s10, %s5909_s5 }
  0x4f   : > { %p4824_p12 = pnand %p4822_p11, %p5178_p8 }
  0x51   : > { %p4825_p13 = pneg %p4824_p12 }
  0x53   : > { %p4830_p2 = pnand %p4828_p0, %p4825_p13 }
  0x55   : > { %4833 = shalt.err (!%p4830_p2)
}
  0x56   : > { %s4834_s15 = scalar_lea.vmem %s284_s19, 12288  ;;  %p4842_p5 = scmp.lt.s32.totalorder %s284_s19, %s284_s19 }
  0x57   : > { %p4835_p4 = scmp.ne.s32.totalorder %s284_s19, %s4834_s15  ;;  %p4843_p10 = scmp.lt.s32.totalorder %s4834_s15, %s4834_s15 }
  0x59   : > { %p4837_p7 = pnand %p4835_p4, %p5178_p8  ;;  %p4844_p3 = por %p4843_p10, %p4842_p5 }
  0x5b   : > { %p4838_p9 = pneg %p4837_p7 }
  0x5d   : > { %p4845_p1 = pnand %p4844_p3, %p4838_p9 }
  0x5f   : > { %4848 = shalt.err (!%p4845_p1)
}
  0x60   : > { %s5930_s1 = smov 4   ;;  %s5931_s13 = smov 64  }
  0x61   : > { %4223 = dma.hbm_to_vmem [thread:$0]  (!%p5164_p6), %s5909_s5, 12288, %s284_s19, [#allocation13], %s5931_s13, %s5931_s13, %s5930_s1  }
  0x62   : > { %s5932_s2 = sld [smem:[#allocation22_spill]] }
  0x68   : > { %s4849_s21 = scalar_lea.hbm %s5932_s2, 16 }
  0x69   : > { %p4850_p11 = scmp.ne.s32.totalorder %s5932_s2, %s4849_s21  ;;  %p4856_p12 = scmp.lt.u32.totalorder %s4849_s21, %s5932_s2 }
  0x6b   : > { %p4852_p1 = pnand %p4850_p11, %p5178_p8 }
  0x6d   : > { %p4853_p3 = pneg %p4852_p1 }
  0x6f   : > { %p4858_p13 = pnand %p4856_p12, %p4853_p3 }
  0x71   : > { %4861 = shalt.err (!%p4858_p13)
}
  0x72   : > { %s4862_s19 = scalar_lea.vmem %s5225_s22, 16  ;;  %s4869_s15 = scalar_lea.vmem %s5225_s22, 32 }
  0x73   : > { %p4863_p0 = scmp.ne.s32.totalorder %s5225_s22, %s4862_s19  ;;  %p4870_p7 = scmp.lt.s32.totalorder %s5225_s22, %s5225_s22 }
  0x74   : > { %p4871_p9 = scmp.lt.s32.totalorder %s4869_s15, %s4862_s19 }
  0x75   : > { %p4865_p2 = pnand %p4863_p0, %p5178_p8 }
  0x76   : > { %p4872_p5 = por %p4871_p9, %p4870_p7 }
  0x77   : > { %p4866_p4 = pneg %p4865_p2 }
  0x79   : > { %p4873_p10 = pnand %p4872_p5, %p4866_p4 }
  0x7b   : > { %4876 = shalt.err (!%p4873_p10)
}
  0x7c   : > { %4214 = dma.hbm_to_vmem [thread:$0]  (!%p5164_p6), %s5932_s2, 16, %s5225_s22, [#allocation7]  }
  0x7d   : > { %s5067_s17 = smov [#allocation11]   ;;  %s5068_s21 = smov [#allocation14]  }
  0x7e   : > { %s273_s18 = sshll.u32 %s5067_s17, 4  ;;  %s297_s23 = sshll.u32 %s5068_s21, 4  ;;  %s274_s18 = int_to_ptr.vmem [resolvable:$true] %s273_s18  ;;  %s5272_s23 = int_to_ptr.vmem [resolvable:$true] %s297_s23 }
  0x7f   : > { %s4877_s14 = scalar_lea.hbm %s5908_s4, 192 }
  0x80   : > { %p4878_p11 = scmp.ne.s32.totalorder %s5908_s4, %s4877_s14  ;;  %p4884_p12 = scmp.lt.u32.totalorder %s4877_s14, %s5908_s4 }
  0x82   : > { %p4880_p1 = pnand %p4878_p11, %p5178_p8 }
  0x84   : > { %p4881_p3 = pneg %p4880_p1 }
  0x86   : > { %p4886_p13 = pnand %p4884_p12, %p4881_p3 }
  0x88   : > { %4889 = shalt.err (!%p4886_p13)
}
  0x89   : > { %s4890_s10 = scalar_lea.vmem %s274_s18, 192  ;;  %p4898_p7 = scmp.lt.s32.totalorder %s274_s18, %s274_s18 }
  0x8a   : > { %p4891_p0 = scmp.ne.s32.totalorder %s274_s18, %s4890_s10  ;;  %p4899_p9 = scmp.lt.s32.totalorder %s4890_s10, %s4890_s10 }
  0x8c   : > { %p4893_p2 = pnand %p4891_p0, %p5178_p8  ;;  %p4900_p5 = por %p4899_p9, %p4898_p7 }
  0x8e   : > { %p4894_p4 = pneg %p4893_p2 }
  0x90   : > { %p4901_p10 = pnand %p4900_p5, %p4894_p4 }
  0x92   : > { %4904 = shalt.err (!%p4901_p10)
}
  0x93   : > { %4220 = dma.hbm_to_vmem [thread:$0]  (!%p5164_p6), %s5908_s4, 192, %s274_s18, [#allocation10]  }
  0x94   : > { %s4905_s14 = scalar_lea.hbm %s5910_s6, 16 }
  0x95   : > { %p4906_p11 = scmp.ne.s32.totalorder %s5910_s6, %s4905_s14  ;;  %p4912_p12 = scmp.lt.u32.totalorder %s4905_s14, %s5910_s6 }
  0x97   : > { %p4908_p1 = pnand %p4906_p11, %p5178_p8 }
  0x99   : > { %p4909_p3 = pneg %p4908_p1 }
  0x9b   : > { %p4914_p13 = pnand %p4912_p12, %p4909_p3 }
  0x9d   : > { %4917 = shalt.err (!%p4914_p13)
}
  0x9e   : > { %s4918_s18 = scalar_lea.vmem %s5272_s23, 16  ;;  %s4925_s10 = scalar_lea.vmem %s5272_s23, 32 }
  0x9f   : > { %p4919_p0 = scmp.ne.s32.totalorder %s5272_s23, %s4918_s18  ;;  %p4926_p7 = scmp.lt.s32.totalorder %s5272_s23, %s5272_s23 }
  0xa0   : > { %p4927_p9 = scmp.lt.s32.totalorder %s4925_s10, %s4918_s18 }
  0xa1   : > { %p4921_p2 = pnand %p4919_p0, %p5178_p8 }
  0xa2   : > { %p4928_p5 = por %p4927_p9, %p4926_p7 }
  0xa3   : > { %p4922_p4 = pneg %p4921_p2 }
  0xa5   : > { %p4929_p10 = pnand %p4928_p5, %p4922_p4 }
  0xa7   : > { %4932 = shalt.err (!%p4929_p10)
}
  0xa8   : > { %4226 = dma.hbm_to_vmem [thread:$0]  (!%p5164_p6), %s5910_s6, 16, %s5272_s23, [#allocation13]  }
  0xa9   : > { %s3741_s20 = sadd.s32 4294967294, %s5057_s29   ;;  %s38_s11 = sadd.s32 1, %s5053_s28 }
  0xaa   : > { %p40_p8 = scmp.ge.s32.totalorder %s38_s11, 2  ;;  %s47_s12 = sadd.s32 1, %s5045_s26 }
  0xab   : > { %p54_p11 = scmp.ne.s32.totalorder %s5045_s26, %s5041_s25  ;;  %p55_p1 = scmp.eq.s32.totalorder %s5057_s29, 0 }
  0xac   : > { %s5951_s11 = smov (%p40_p8, %s38_s11), 0  ;;  %p60_p12 = scmp.ne.s32.totalorder %s5041_s25, %s5037_s24 }
  0xad   : > { %p5324_p3 = por %p55_p1, %p54_p11  ;;  %s42_s23 = ssub.s32 %s5053_s28, %s5951_s11 }
  0xae   : > { %s5934_s14 = sadd.s32 4294967295, %s5057_s29   ;;  %p45_p13 = scmp.eq.s32.totalorder %s42_s23, 0 }
  0xaf   : > { %p210_p6 = scmp.eq.s32.totalorder %s5934_s14, 1  ;;  %p5935_p0 = scmp.ne.s32.totalorder %s5924_s8, 0 }
  0xb0   : > { %p216_p7 = scmp.eq.s32.totalorder %s3741_s20, 1  ;;  %p4241_p5 = scmp.lt.s32.totalorder %s5057_s29, 2 }
  0xb1   : > { %p5336_p2 = por %p5935_p0, %p60_p12  ;;  %p5340_p4 = por %p210_p6, %p54_p11 }
  0xb2   : > { %s5345_s30 = scalar_select %p45_p13, %s5045_s26, %s47_s12  }
  0xb3   : > { %s5937_s15 = scalar_select %p5340_p4, 1, 0 }
  0xb4   : > { %p5347_p9 = por %p216_p7, %p60_p12  ;;  %s308_s18 = sand.u32 1, %s5045_s26  }
  0xb5   : > { %s4029_s10 = sshll.u32 %s5053_s28, 9  ;;  %s3750_s17 = sshll.u32 %s308_s18, 5 }
  0xb6   : > { %s5938_s22 = scalar_select %p5347_p9, 1, 0 }
  0xb7   : > { %s5357_s14 = scalar_lea.hbm %s5904_s0, %s4029_s10  ;;  %s312_s20 = scalar_lea.vmem [#allocation3], %s3750_s17 }
  0xb8   : > { %s321_s12 = sshll.u32 %s312_s20, 4  ;;  %p5361_p10 = pnand %p4241_p5, %p5324_p3  ;;  %s5365_s12 = int_to_ptr.vmem [resolvable:$true] %s321_s12 }
  0xb9   : > { %s5367_s3 = scalar_lea.sflag [#allocation4], %s308_s18  ;;  %s4933_s21 = scalar_lea.hbm %s5357_s14, 512 }
  0xba   : > { %p4934_p8 = scmp.ne.s32.totalorder %s5357_s14, %s4933_s21  ;;  %p4935_p11 = pneg %p5361_p10 }
  0xbb   : > { %s4938_s17 = scalar_lea.hbm %s5904_s0, 1024  ;;  %p4939_p3 = scmp.lt.u32.totalorder %s5357_s14, %s5904_s0 }
  0xbc   : > { %p4936_p1 = pnand %p4935_p11, %p4934_p8  ;;  %p4940_p6 = scmp.lt.u32.totalorder %s4938_s17, %s4933_s21 }
  0xbd   : > { %p4942_p0 = scmp.lt.u32.totalorder %s4933_s21, %s5357_s14 }
  0xbe   : > { %p4937_p12 = pneg %p4936_p1  ;;  %p4941_p13 = por %p4940_p6, %p4939_p3 }
  0xc0   : > { %p4943_p7 = por %p4942_p0, %p4941_p13 }
  0xc2   : > { %p4944_p5 = pnand %p4943_p7, %p4937_p12 }
  0xc4   : > { %4947 = shalt.err (!%p4944_p5)
}
  0xc5   : > { %s4948_s18 = scalar_lea.vmem %s5365_s12, 512  ;;  %s5069_s10 = smov [#allocation3]  }
  0xc6   : > { %p4949_p8 = scmp.ne.s32.totalorder %s5365_s12, %s4948_s18  ;;  %s4953_s16 = sshll.u32 %s5069_s10, 4  ;;  %s4954_s16 = int_to_ptr.vmem [resolvable:$false] %s4953_s16 }
  0xc7   : > { %s4955_s23 = scalar_lea.vmem %s4954_s16, 1024  ;;  %p4956_p4 = scmp.lt.s32.totalorder %s5365_s12, %s4954_s16 }
  0xc8   : > { %p4951_p1 = pnand %p4949_p8, %p4935_p11  ;;  %p4957_p3 = scmp.lt.s32.totalorder %s4955_s23, %s4948_s18 }
  0xca   : > { %p4952_p9 = pneg %p4951_p1  ;;  %p4958_p6 = por %p4957_p3, %p4956_p4 }
  0xcc   : > { %p4959_p13 = pnand %p4958_p6, %p4952_p9 }
  0xce   : > { %4962 = shalt.err (!%p4959_p13)
}
  0xcf   : > { %4230 = dma.hbm_to_vmem [thread:$0]  (!%p5361_p10), %s5357_s14, 512, %s5365_s12, %s5367_s3, %s5931_s13, %s5931_s13, %s5930_s1  }
  0xd0   : > { %p5940_p11 = scmp.ne.s32.totalorder %s5925_s9, 0 }
  0xd1   : > { %s5401_s21 = sand.u32 (!%p5940_p11), 1, %s5041_s25  }
  0xd2   : > { %333 = sbr.rel (%p5940_p11) target bundleno = 1288 (0x508), region = 48  ;;  %s3754_s17 = sshll.u32 (!%p5940_p11), %s5401_s21, 5 }
  0xd3   : > { %s336_s20 = scalar_lea.sflag (!%p5940_p11), [#allocation4], %s5401_s21  ;;  %s339_s18 = scalar_lea.vmem (!%p5940_p11), [#allocation3], %s3754_s17 }
  0xd9   : > { %5016 = dma.done.wait (%p5336_p2), %s336_s20, 512  }
  0xda   : > { %5018 = vsyncadd (%p5336_p2), %s336_s20, 4294966784  ;;  %p5941_p4 = scmp.ne.s32.totalorder %s5924_s8, 0 }
  0xdc   : > { %5020 = dma.done.wait (%p5941_p4), [#allocation7], 272  }
  0xdd   : > { %5022 = vsyncadd (%p5941_p4), [#allocation7], 4294967024 }
  0xde   : > { %5024 = dma.done.wait (%p5941_p4), [#allocation10], 12480  }
  0xdf   : > { %5026 = vsyncadd (%p5941_p4), [#allocation10], 4294954816 }
  0xe0   : > { %5028 = dma.done.wait (%p5941_p4), [#allocation13], 12304  }
  0xe1   : > { %5030 = vsyncadd (%p5941_p4), [#allocation13], 4294954992  ;;  %v4310_v0 = vld [vmem:[#allocation6] sm:$0xff]   ;;  %v4311_v1 = vld [vmem:[#allocation6 + $0x8] sm:$0xff]   ;;  %vm457_vm0 = vcmask 261120   ;;  %v5070_v40 = vmov 0   ;;  %v543_v41 = vlaneseq }
  0xe2   : > { %4168 = vmatprep.subr.bf16.mxu0 %v4310_v0  ;;  %v4312_v2 = vld [vmem:[%s339_s18] sm:$0xff]   ;;  %v4313_v3 = vld [vmem:[%s339_s18 + $0x8] sm:$0xff]   ;;  %v4314_v4 = vld [vmem:[%s339_s18 + $0x10] sm:$0xff]   ;;  %1191 = vmatprep.mubr.bf16.mxu1 %v5070_v40  ;;  %vm2259_vm2 = vcmask 523264   ;;  %s3761_s2 = sshll.u32 %s5401_s21, 3  ;;  %s4026_s3 = sshll.u32 %s5049_s27, 7 }
  0xe3   : > { %4169 = vmatpush3.bf16.msra.mxu0 %v4310_v0  ;;  %4172 = vmatprep.mubr.msk.bf16.mxu0 %vm457_vm0, %v4312_v2  ;;  %v4315_v5 = vld [vmem:[%s339_s18 + $0x18] sm:$0xff]   ;;  %v4321_v9 = vld [vmem:[#allocation9] ss:$48 sps:$4 sm:$0xff]   ;;  %v5424_v42 = vshrl.u32 %v543_v41, 7  ;;  %v539_v43 = vld [vmem:[#allocation8] sm:$0x1]  ;;  %s5855_s19 = scalar_lea.hbm %s5911_s7, %s4026_s3 }
  0xe4   : > { %4170 = vmatprep.subr.bf16.mxu0 %v4311_v1  ;;  %v4316_v6 = vld [vmem:[#allocation9 + $0x4] ss:$48 sps:$4 sm:$0xff]   ;;  %v4320_v7 = vld [vmem:[#allocation9 + $0xc] ss:$48 sps:$4 sm:$0xff]   ;;  %v4318_v8 = vld [vmem:[#allocation9 + $0x8] ss:$48 sps:$4 sm:$0xff]   ;;  %v541_v44 = vpack.i.b16 %v539_v43, %v539_v43 }
  0xe5   : > { %1159 = vmatprep.subr.bf16.mxu1 %v4316_v6  ;;  %v4322_v10 = vld [vmem:[#allocation9 + $0x64] ss:$48 sps:$4 sm:$0xff]   ;;  %v4326_v11 = vld [vmem:[#allocation9 + $0x6c] ss:$48 sps:$4 sm:$0xff]   ;;  %v4324_v12 = vld [vmem:[#allocation9 + $0x68] ss:$48 sps:$4 sm:$0xff]  }
  0xe6   : > { %1160 = vmatpush1.bf16.msra.mxu1 %v4321_v9  ;;  %v4327_v13 = vld [vmem:[#allocation9 + $0x60] ss:$48 sps:$4 sm:$0xff]   ;;  %v4328_v14 = vld [vmem:[#allocation9 + $0xc4] ss:$48 sps:$4 sm:$0xff]   ;;  %v4332_v15 = vld [vmem:[#allocation9 + $0xcc] ss:$48 sps:$4 sm:$0xff]  }
  0xe7   : > { %4171 = vmatpush3.bf16.msra.mxu0 %v4311_v1  ;;  %1161 = vmatprep.subr.bf16.mxu1 %v4322_v10  ;;  %v4330_v16 = vld [vmem:[#allocation9 + $0xc8] ss:$48 sps:$4 sm:$0xff]   ;;  %v4333_v17 = vld [vmem:[#allocation9 + $0xc0] ss:$48 sps:$4 sm:$0xff]   ;;  %v4334_v18 = vld [vmem:[#allocation9 + $0x124] ss:$48 sps:$4 sm:$0xff]  }
  0xe8   : > { %1232 = vmatprep.subr.bf16.mxu0 %v4320_v7  ;;  %v4338_v19 = vld [vmem:[#allocation9 + $0x12c] ss:$48 sps:$4 sm:$0xff]   ;;  %v4336_v20 = vld [vmem:[#allocation9 + $0x128] ss:$48 sps:$4 sm:$0xff]   ;;  %v4339_v21 = vld [vmem:[#allocation9 + $0x120] ss:$48 sps:$4 sm:$0xff]  }
  0xe9   : > { %v4340_v22 = vld [vmem:[#allocation9 + $0x184] ss:$48 sps:$4 sm:$0xff]   ;;  %v4344_v23 = vld [vmem:[#allocation9 + $0x18c] ss:$48 sps:$4 sm:$0xff]   ;;  %v4342_v24 = vld [vmem:[#allocation9 + $0x188] ss:$48 sps:$4 sm:$0xff]  }
  0xea   : > { %4173 = vmatmul.mubr.msk.bf16.vlgmr.msra.gmra.mrb[0].mxu0 %vm457_vm0, %v4313_v3  ;;  %1162 = vmatpush1.bf16.msra.mxu1 %v4327_v13  ;;  %v4345_v25 = vld [vmem:[#allocation9 + $0x180] ss:$48 sps:$4 sm:$0xff]   ;;  %v4346_v26 = vld [vmem:[#allocation9 + $0x1e4] ss:$48 sps:$4 sm:$0xff]   ;;  %v4350_v27 = vld [vmem:[#allocation9 + $0x1ec] ss:$48 sps:$4 sm:$0xff]  }
  0xeb   : > { %4176 = vmatprep.mubr.msk.bf16.mxu0 %vm457_vm0, %v4314_v4  ;;  %1233 = vmatpush1.bf16.msra.mxu0 %v4318_v8  ;;  %v4348_v28 = vld [vmem:[#allocation9 + $0x1e8] ss:$48 sps:$4 sm:$0xff]   ;;  %v4351_v29 = vld [vmem:[#allocation9 + $0x1e0] ss:$48 sps:$4 sm:$0xff]   ;;  %v4352_v30 = vld [vmem:[#allocation9 + $0x244] ss:$48 sps:$4 sm:$0xff]  }
  0xec   : > { %1234 = vmatprep.subr.bf16.mxu0 %v4326_v11  ;;  %1163 = vmatprep.subr.bf16.mxu1 %v4328_v14  ;;  %v4356_v31 = vld [vmem:[#allocation9 + $0x24c] ss:$48 sps:$4 sm:$0xff]   ;;  %v4354_v32 = vld [vmem:[#allocation9 + $0x248] ss:$48 sps:$4 sm:$0xff]   ;;  %v4357_v33 = vld [vmem:[#allocation9 + $0x240] ss:$48 sps:$4 sm:$0xff]  }
  0xed   : > { %v4358_v34 = vld [vmem:[#allocation9 + $0x2a4] ss:$48 sps:$4 sm:$0xff]   ;;  %v4362_v35 = vld [vmem:[#allocation9 + $0x2ac] ss:$48 sps:$4 sm:$0xff]   ;;  %v4360_v36 = vld [vmem:[#allocation9 + $0x2a8] ss:$48 sps:$4 sm:$0xff]  }
  0xee   : > { %1164 = vmatpush1.bf16.msra.mxu1 %v4333_v17  ;;  %v4363_v37 = vld [vmem:[#allocation9 + $0x2a0] ss:$48 sps:$4 sm:$0xff]   ;;  %v4366_v38 = vld [vmem:[#allocation9 + $0x14] ss:$48 sps:$4 sm:$0xff]   ;;  %v4369_v39 = vld [vmem:[#allocation9 + $0x1c] ss:$48 sps:$4 sm:$0xff]  }
  0xef   : > { %1235 = vmatpush1.bf16.msra.mxu0 %v4324_v12  ;;  %1165 = vmatprep.subr.bf16.mxu1 %v4334_v18  ;;  %v5427_v45 = vsub.s32 0, %v5424_v42  ;;  %v4364_v12 = vld [vmem:[#allocation9 + $0x10] ss:$48 sps:$4 sm:$0xff]   ;;  %v4367_v13 = vld [vmem:[#allocation9 + $0x18] ss:$48 sps:$4 sm:$0xff]   ;;  %s393_s8 = scalar_lea.vmem [#allocation15], %s3761_s2 }
  0xf0   : > { %1236 = vmatprep.subr.bf16.mxu0 %v4332_v15  ;;  %v4372_v15 = vld [vmem:[#allocation9 + $0x74] ss:$48 sps:$4 sm:$0xff]   ;;  %s3602_s9 = sshll.u32 %s393_s8, 4  ;;  %s3589_s14 = scalar_lea.sflag [#allocation5], %s5401_s21  ;;  %s5857_s9 = int_to_ptr.vmem [resolvable:$true] %s3602_s9 }
  0xf1   : > { %v546_v48 = vrot.slane %v541_v44, %v5427_v45  ;;  %v4394_v44 = vld [vmem:[#allocation9 + $0x1f0] ss:$48 sps:$4 sm:$0xff]   ;;  %s4963_s12 = scalar_lea.vmem %s5857_s9, 128  ;;  %p5942_p9 = scmp.ne.s32.totalorder %s5937_s15, 0 }
  0xf2   : > { %4177 = vmatmul.mubr.msk.bf16.gmra.mrb[4].mxu0 %vm457_vm0, %v4315_v5  ;;  %1166 = vmatpush1.bf16.msra.mxu1 %v4339_v21  ;;  %p4964_p2 = scmp.ne.s32.totalorder %s5857_s9, %s4963_s12  ;;  %s5073_s27 = smov [#allocation15]  }
  0xf3   : > { %1237 = vmatpush1.bf16.msra.mxu0 %v4330_v16  ;;  %1167 = vmatprep.subr.bf16.mxu1 %v4340_v22  ;;  %v4375_v16 = vld [vmem:[#allocation9 + $0x7c] ss:$48 sps:$4 sm:$0xff]   ;;  %v4378_v22 = vld [vmem:[#allocation9 + $0xd4] ss:$48 sps:$4 sm:$0xff]   ;;  %s4967_s10 = sshll.u32 %s5073_s27, 4  ;;  %s4968_s10 = int_to_ptr.vmem [resolvable:$false] %s4967_s10 }
  0xf4   : > { %1238 = vmatprep.subr.bf16.mxu0 %v4338_v19  ;;  %1264 = vmatprep.mubr.bf16.mxu0 %v5070_v40  ;;  %v4370_v19 = vld [vmem:[#allocation9 + $0x70] ss:$48 sps:$4 sm:$0xff]   ;;  %p4965_p10 = pnand %p4964_p2, %p5942_p9  ;;  %s4969_s16 = scalar_lea.vmem %s4968_s10, 256 }
  0xf5   : > { %p4970_p0 = scmp.lt.s32.totalorder %s5857_s9, %s4968_s10  ;;  %p4971_p7 = scmp.lt.s32.totalorder %s4969_s16, %s4963_s12 }
  0xf6   : > { %1168 = vmatpush1.bf16.msra.mxu1 %v4345_v25  ;;  %v4379_v25 = vld [vmem:[#allocation9 + $0xd8] ss:$48 sps:$4 sm:$0xff]   ;;  %p4966_p12 = pneg %p4965_p10 }
  0xf7   : > { %1239 = vmatpush1.bf16.msra.mxu0 %v4336_v20  ;;  %1169 = vmatprep.subr.bf16.mxu1 %v4346_v26  ;;  %v4373_v20 = vld [vmem:[#allocation9 + $0x78] ss:$48 sps:$4 sm:$0xff]   ;;  %p4972_p5 = por %p4971_p7, %p4970_p0 }
  0xf8   : > { %1240 = vmatprep.subr.bf16.mxu0 %v4344_v23  ;;  %v4381_v23 = vld [vmem:[#allocation9 + $0xdc] ss:$48 sps:$4 sm:$0xff]  }
  0xf9   : > { %p4973_p8 = pnand %p4972_p5, %p4966_p12 }
  0xfa   : > { %1170 = vmatpush1.bf16.msra.mxu1 %v4351_v29 }
  0xfb   : > { %1241 = vmatpush1.bf16.msra.mxu0 %v4342_v24  ;;  %1171 = vmatprep.subr.bf16.mxu1 %v4352_v30  ;;  %v4376_v24 = vld [vmem:[#allocation9 + $0xd0] ss:$48 sps:$4 sm:$0xff]  }
  0xfc   : > { %1242 = vmatprep.subr.bf16.mxu0 %v4350_v27  ;;  %v4384_v27 = vld [vmem:[#allocation9 + $0x134] ss:$48 sps:$4 sm:$0xff]   ;;  %v4382_v30 = vld [vmem:[#allocation9 + $0x130] ss:$48 sps:$4 sm:$0xff]  }
  0xfe   : > { %1172 = vmatpush1.bf16.msra.mxu1 %v4357_v33  ;;  %v4390_v33 = vld [vmem:[#allocation9 + $0x194] ss:$48 sps:$4 sm:$0xff]  }
  0xff   : > { %1243 = vmatpush1.bf16.msra.mxu0 %v4348_v28  ;;  %1173 = vmatprep.subr.bf16.mxu1 %v4358_v34  ;;  %v4387_v28 = vld [vmem:[#allocation9 + $0x13c] ss:$48 sps:$4 sm:$0xff]  }
 0x100   : > { %1244 = vmatprep.subr.bf16.mxu0 %v4356_v31  ;;  %v4385_v31 = vld [vmem:[#allocation9 + $0x138] ss:$48 sps:$4 sm:$0xff]   ;;  %v4393_v34 = vld [vmem:[#allocation9 + $0x19c] ss:$48 sps:$4 sm:$0xff]  }
 0x102   : > { %1174 = vmatpush1.bf16.msra.mxu1 %v4363_v37 }
 0x103   : > { %1245 = vmatpush1.bf16.msra.mxu0 %v4354_v32  ;;  %1305 = vmatprep.subr.bf16.mxu1 %v4366_v38  ;;  %v4396_v38 = vld [vmem:[#allocation9 + $0x1f4] ss:$48 sps:$4 sm:$0xff]  }
 0x104   : > { %1246 = vmatprep.subr.bf16.mxu0 %v4362_v35  ;;  %v4388_v35 = vld [vmem:[#allocation9 + $0x190] ss:$48 sps:$4 sm:$0xff]  }
 0x107   : > { %1247 = vmatpush1.bf16.msra.mxu0 %v4360_v36  ;;  %v4391_v36 = vld [vmem:[#allocation9 + $0x198] ss:$48 sps:$4 sm:$0xff]  }
 0x108   : > { %1378 = vmatprep.subr.bf16.mxu0 %v4369_v39  ;;  %v4399_v39 = vld [vmem:[#allocation9 + $0x1fc] ss:$48 sps:$4 sm:$0xff]  }
 0x1bd   : > { %v4174_v46 = vpop.f32.mrb[0].mxu0 }
 0x1be   : > { %v504_v47 = vpop.f32.mrb[1].mxu0 }
 0x1bf   : > { %v4175_v49 = vpop.f32.mrb[2].mxu0 }
 0x1c0   : > { %v536_v50 = vpack.c.bf16 %v4175_v49, %v4174_v46  ;;  %v507_v51 = vpop.f32.mrb[3].mxu0  ;;  %v4397_v46 = vld [vmem:[#allocation9 + $0x1f8] ss:$48 sps:$4 sm:$0xff]   ;;  %v4405_v49 = vld [vmem:[#allocation9 + $0x25c] ss:$48 sps:$4 sm:$0xff]  }
 0x1c1   : > { %v535_v52 = vpack.c.bf16 %v507_v51, %v504_v47  ;;  %v4403_v51 = vld [vmem:[#allocation9 + $0x258] ss:$48 sps:$4 sm:$0xff]  }
 0x1c2   : > { %v548_v53 = vadd.bf16 %v546_v48, %v536_v50  ;;  %v4400_v50 = vld [vmem:[#allocation9 + $0x250] ss:$48 sps:$4 sm:$0xff]  }
 0x1c3   : > { %v547_v54 = vadd.bf16 %v546_v48, %v535_v52 }
 0x1c4   : > { %v3773_v55 = vmul.bf16 3216621497, %v548_v53 }
 0x1c5   : > { %v3772_v56 = vmul.bf16 3216621497, %v547_v54  ;;  %v4178_v57 = vpop.f32.mrb[4].mxu0 }
 0x1c6   : > { %4557 = vpow.bf16 %v3773_v55  ;;  %v520_v58 = vpop.f32.mrb[5].mxu0  ;;  %v4406_v55 = vld [vmem:[#allocation9 + $0x2b0] ss:$48 sps:$4 sm:$0xff]  }
 0x1c7   : > { %4559 = vpow.bf16 %v3772_v56  ;;  %v4179_v59 = vpop.f32.mrb[6].mxu0  ;;  %v4409_v56 = vld [vmem:[#allocation9 + $0x2b8] ss:$48 sps:$4 sm:$0xff]  }
 0x1c8   : > { %v538_v60 = vpack.c.bf16 %v4179_v59, %v4178_v57  ;;  %v523_v61 = vpop.f32.mrb[7].mxu0  ;;  %v4414_v57 = vld [vmem:[#allocation9 + $0x24] ss:$48 sps:$4 sm:$0xff]   ;;  %v4412_v59 = vld [vmem:[#allocation9 + $0x20] ss:$48 sps:$4 sm:$0xff]  }
 0x1c9   : > { %v537_v62 = vpack.c.bf16 %v523_v61, %v520_v58  ;;  %v4417_v58 = vld [vmem:[#allocation9 + $0x2c] ss:$48 sps:$4 sm:$0xff]   ;;  %v4420_v61 = vld [vmem:[#allocation9 + $0x84] ss:$48 sps:$4 sm:$0xff]  }
 0x1ca   : > { %v5433_v1 = vadd.bf16 %v546_v48, %v538_v60  ;;  %v4415_v60 = vld [vmem:[#allocation9 + $0x28] ss:$48 sps:$4 sm:$0xff]  }
 0x1cb   : > { %v5430_v63 = vadd.bf16 %v546_v48, %v537_v62  ;;  %v4402_v48 = vld [vmem:[#allocation9 + $0x254] ss:$48 sps:$4 sm:$0xff]   ;;  %v4423_v62 = vld [vmem:[#allocation9 + $0x8c] ss:$48 sps:$4 sm:$0xff]  }
 0x1cc   : > { %v3775_v5 = vmul.bf16 3216621497, %v5433_v1 }
 0x1cd   : > { %v3774_v0 = vmul.bf16 3216621497, %v5430_v63 }
 0x1cf   : > { %4561 = vpow.bf16 %v3774_v0  ;;  %v4421_v0 = vld [vmem:[#allocation9 + $0x88] ss:$48 sps:$4 sm:$0xff]  }
 0x1d1   : > { %v4558_v2 = vpop.eup %4557 }
 0x1d2   : > { %v4560_v3 = vpop.eup %4559  ;;  %v568_v6 = vadd.bf16 1065369472, %v4558_v2  ;;  %v4429_v2 = vld [vmem:[#allocation9 + $0xec] ss:$48 sps:$4 sm:$0xff]  }
 0x1d3   : > { %v567_v4 = vadd.bf16 1065369472, %v4560_v3  ;;  %v4424_v3 = vld [vmem:[#allocation9 + $0xe0] ss:$48 sps:$4 sm:$0xff]  }
 0x1d5   : > { %4563 = vrcp.bf16 %v567_v4  ;;  %v4427_v4 = vld [vmem:[#allocation9 + $0xe8] ss:$48 sps:$4 sm:$0xff]  }
 0x1d6   : > { %4565 = vpow.bf16 %v3775_v5  ;;  %v4432_v5 = vld [vmem:[#allocation9 + $0x144] ss:$48 sps:$4 sm:$0xff]  }
 0x1d7   : > { %4567 = vrcp.bf16 %v568_v6  ;;  %v4435_v6 = vld [vmem:[#allocation9 + $0x14c] ss:$48 sps:$4 sm:$0xff]  }
 0x1da   : > { %v4562_v7 = vpop.eup %4561 }
 0x1db   : > { %v569_v8 = vadd.bf16 1065369472, %v4562_v7  ;;  %v4430_v7 = vld [vmem:[#allocation9 + $0x140] ss:$48 sps:$4 sm:$0xff]  }
 0x1dd   : > { %4569 = vrcp.bf16 %v569_v8  ;;  %v4433_v8 = vld [vmem:[#allocation9 + $0x148] ss:$48 sps:$4 sm:$0xff]  }
 0x1e0   : > { %v4564_v9 = vpop.eup %4563 }
 0x1e1   : > { %v572_v10 = vmul.bf16 1065369472, %v4564_v9  ;;  %v4566_v11 = vpop.eup %4565  ;;  %v4438_v9 = vld [vmem:[#allocation9 + $0x1a4] ss:$48 sps:$4 sm:$0xff]  }
 0x1e2   : > { %v4568_v17 = vpop.eup %4567  ;;  %v570_v18 = vadd.bf16 1065369472, %v4566_v11  ;;  %v4436_v11 = vld [vmem:[#allocation9 + $0x1a0] ss:$48 sps:$4 sm:$0xff]  }
 0x1e3   : > { %v5436_v14 = vmul.bf16 %v572_v10, %v547_v54  ;;  %v574_v21 = vmul.bf16 1065369472, %v4568_v17  ;;  %v4411_v54 = vld [vmem:[#allocation9 + $0x2bc] ss:$48 sps:$4 sm:$0xff]   ;;  %v4445_v17 = vld [vmem:[#allocation9 + $0x208] ss:$48 sps:$4 sm:$0xff]  }
 0x1e4   : > { %4571 = vrcp.bf16 %v570_v18  ;;  %v4441_v10 = vld [vmem:[#allocation9 + $0x1ac] ss:$48 sps:$4 sm:$0xff]   ;;  %v4450_v18 = vld [vmem:[#allocation9 + $0x264] ss:$48 sps:$4 sm:$0xff]  }
 0x1e5   : > { %1192 = vmatmul.mubr.bf16.vlgmr.msra.gmra.mrb[0].mxu1 %v5436_v14  ;;  %1265 = vmatmul.mubr.bf16.vlgmr.msra.gmra.mrb[8].mxu0 %v5436_v14  ;;  %v5442_v26 = vmul.bf16 %v574_v21, %v548_v53  ;;  %v4408_v53 = vld [vmem:[#allocation9 + $0x2b4] ss:$48 sps:$4 sm:$0xff]   ;;  %v4451_v21 = vld [vmem:[#allocation9 + $0x268] ss:$48 sps:$4 sm:$0xff]  }
 0x1e6   : > { %1306 = vmatpush1.bf16.msra.mxu1 %v4364_v12  ;;  %1379 = vmatpush1.bf16.msra.mxu0 %v4367_v13  ;;  %v4439_v12 = vld [vmem:[#allocation9 + $0x1a8] ss:$48 sps:$4 sm:$0xff]   ;;  %v4444_v13 = vld [vmem:[#allocation9 + $0x204] ss:$48 sps:$4 sm:$0xff]  }
 0x1e7   : > { %1307 = vmatprep.subr.bf16.mxu1 %v4372_v15  ;;  %1380 = vmatprep.subr.bf16.mxu0 %v4375_v16  ;;  %v4447_v15 = vld [vmem:[#allocation9 + $0x20c] ss:$48 sps:$4 sm:$0xff]   ;;  %v4442_v16 = vld [vmem:[#allocation9 + $0x200] ss:$48 sps:$4 sm:$0xff]  }
 0x1e8   : > { %1201 = vmatprep.mubr.bf16.mxu1 %v5070_v40  ;;  %1274 = vmatprep.mubr.bf16.mxu0 %v5070_v40  ;;  %v4570_v29 = vpop.eup %4569 }
 0x1e9   : > { %v576_v32 = vmul.bf16 1065369472, %v4570_v29  ;;  %v1645_v29 = vld [vmem:[#allocation11] sm:$0xff] }
 0x1ea   : > { %1308 = vmatpush1.bf16.msra.mxu1 %v4370_v19  ;;  %1381 = vmatpush1.bf16.msra.mxu0 %v4373_v20  ;;  %v4453_v19 = vld [vmem:[#allocation9 + $0x26c] ss:$48 sps:$4 sm:$0xff]   ;;  %v4448_v20 = vld [vmem:[#allocation9 + $0x260] ss:$48 sps:$4 sm:$0xff]  }
 0x1eb   : > { %1309 = vmatprep.subr.bf16.mxu1 %v4378_v22  ;;  %1382 = vmatprep.subr.bf16.mxu0 %v4381_v23  ;;  %v5449_v37 = vmul.bf16 %v576_v32, %v5430_v63  ;;  %v4418_v63 = vld [vmem:[#allocation9 + $0x80] ss:$48 sps:$4 sm:$0xff]   ;;  %v4456_v22 = vld [vmem:[#allocation9 + $0x2c4] ss:$48 sps:$4 sm:$0xff]   ;;  %v4459_v23 = vld [vmem:[#allocation9 + $0x2cc] ss:$48 sps:$4 sm:$0xff]  }
 0x1ed   : > { %1202 = vmatmul.mubr.bf16.gmra.mrb[4].mxu1 %v5442_v26  ;;  %1275 = vmatmul.mubr.bf16.gmra.mrb[12].mxu0 %v5442_v26 }
 0x1ee   : > { %1310 = vmatpush1.bf16.msra.mxu1 %v4376_v24  ;;  %1383 = vmatpush1.bf16.msra.mxu0 %v4379_v25  ;;  %v4454_v24 = vld [vmem:[#allocation9 + $0x2c0] ss:$48 sps:$4 sm:$0xff]   ;;  %v4457_v25 = vld [vmem:[#allocation9 + $0x2c8] ss:$48 sps:$4 sm:$0xff]  }
 0x1ef   : > { %1311 = vmatprep.subr.bf16.mxu1 %v4384_v27  ;;  %1384 = vmatprep.subr.bf16.mxu0 %v4387_v28  ;;  %v4572_v43 = vpop.eup %4571 }
 0x1f0   : > { %1211 = vmatprep.mubr.bf16.mxu1 %v5070_v40  ;;  %1284 = vmatprep.mubr.bf16.mxu0 %v5070_v40  ;;  %v578_v47 = vmul.bf16 1065369472, %v4572_v43 }
 0x1f2   : > { %1312 = vmatpush1.bf16.msra.mxu1 %v4382_v30  ;;  %1385 = vmatpush1.bf16.msra.mxu0 %v4385_v31  ;;  %v5456_v52 = vmul.bf16 %v578_v47, %v5433_v1  ;;  %v4426_v1 = vld [vmem:[#allocation9 + $0xe4] ss:$48 sps:$4 sm:$0xff]  }
 0x1f3   : > { %1313 = vmatprep.subr.bf16.mxu1 %v4390_v33  ;;  %1386 = vmatprep.subr.bf16.mxu0 %v4393_v34 }
 0x1f5   : > { %1212 = vmatmul.mubr.bf16.gmra.mrb[8].mxu1 %v5449_v37  ;;  %1285 = vmatmul.mubr.bf16.gmra.mrb[16].mxu0 %v5449_v37 }
 0x1f6   : > { %1314 = vmatpush1.bf16.msra.mxu1 %v4388_v35  ;;  %1387 = vmatpush1.bf16.msra.mxu0 %v4391_v36 }
 0x1f7   : > { %1315 = vmatprep.subr.bf16.mxu1 %v4396_v38  ;;  %1388 = vmatprep.subr.bf16.mxu0 %v4399_v39 }
 0x1f8   : > { %1221 = vmatprep.mubr.bf16.mxu1 %v5070_v40  ;;  %1294 = vmatprep.mubr.bf16.mxu0 %v5070_v40 }
 0x1fa   : > { %1316 = vmatpush1.bf16.msra.mxu1 %v4394_v44  ;;  %1389 = vmatpush1.bf16.msra.mxu0 %v4397_v46 }
 0x1fb   : > { %1317 = vmatprep.subr.bf16.mxu1 %v4402_v48  ;;  %1390 = vmatprep.subr.bf16.mxu0 %v4405_v49 }
 0x1fd   : > { %1222 = vmatmul.mubr.bf16.gmra.mrb[12].mxu1 %v5456_v52  ;;  %1295 = vmatmul.mubr.bf16.gmra.mrb[20].mxu0 %v5456_v52 }
 0x1fe   : > { %1318 = vmatpush1.bf16.msra.mxu1 %v4400_v50  ;;  %1391 = vmatpush1.bf16.msra.mxu0 %v4403_v51 }
 0x1ff   : > { %1319 = vmatprep.subr.bf16.mxu1 %v4408_v53  ;;  %1392 = vmatprep.subr.bf16.mxu0 %v4411_v54 }
 0x200   : > { %1337 = vmatprep.mubr.bf16.mxu1 %v5070_v40  ;;  %1410 = vmatprep.mubr.bf16.mxu0 %v5070_v40 }
 0x202   : > { %1320 = vmatpush1.bf16.msra.mxu1 %v4406_v55  ;;  %1393 = vmatpush1.bf16.msra.mxu0 %v4409_v56 }
 0x203   : > { %1451 = vmatprep.subr.bf16.mxu1 %v4414_v57  ;;  %1524 = vmatprep.subr.bf16.mxu0 %v4417_v58 }
 0x205   : > { %1338 = vmatmul.mubr.bf16.vlgmr.msra.gmra.mrb[16].mxu1 %v5436_v14  ;;  %1411 = vmatmul.mubr.bf16.vlgmr.msra.gmra.mrb[24].mxu0 %v5436_v14 }
 0x206   : > { %1452 = vmatpush1.bf16.msra.mxu1 %v4412_v59  ;;  %1525 = vmatpush1.bf16.msra.mxu0 %v4415_v60 }
 0x207   : > { %1453 = vmatprep.subr.bf16.mxu1 %v4420_v61  ;;  %1526 = vmatprep.subr.bf16.mxu0 %v4423_v62 }
 0x208   : > { %1347 = vmatprep.mubr.bf16.mxu1 %v5070_v40  ;;  %1420 = vmatprep.mubr.bf16.mxu0 %v5070_v40 }
 0x20a   : > { %1454 = vmatpush1.bf16.msra.mxu1 %v4418_v63  ;;  %1527 = vmatpush1.bf16.msra.mxu0 %v4421_v0  ;;  %v1649_v63 = vcombine.high %v1645_v29, %v1645_v29 }
 0x20b   : > { %1455 = vmatprep.subr.bf16.mxu1 %v4426_v1  ;;  %1528 = vmatprep.subr.bf16.mxu0 %v4429_v2 }
 0x20d   : > { %1348 = vmatmul.mubr.bf16.gmra.mrb[20].mxu1 %v5442_v26  ;;  %1421 = vmatmul.mubr.bf16.gmra.mrb[28].mxu0 %v5442_v26 }
 0x20e   : > { %1456 = vmatpush1.bf16.msra.mxu1 %v4424_v3  ;;  %1529 = vmatpush1.bf16.msra.mxu0 %v4427_v4 }
 0x20f   : > { %1457 = vmatprep.subr.bf16.mxu1 %v4432_v5  ;;  %1530 = vmatprep.subr.bf16.mxu0 %v4435_v6 }
 0x210   : > { %1357 = vmatprep.mubr.bf16.mxu1 %v5070_v40  ;;  %1430 = vmatprep.mubr.bf16.mxu0 %v5070_v40 }
 0x212   : > { %1458 = vmatpush1.bf16.msra.mxu1 %v4430_v7  ;;  %1531 = vmatpush1.bf16.msra.mxu0 %v4433_v8 }
 0x213   : > { %1459 = vmatprep.subr.bf16.mxu1 %v4438_v9  ;;  %1532 = vmatprep.subr.bf16.mxu0 %v4441_v10 }
 0x215   : > { %1358 = vmatmul.mubr.bf16.gmra.mrb[24].mxu1 %v5449_v37  ;;  %1431 = vmatmul.mubr.bf16.gmra.mrb[32].mxu0 %v5449_v37 }
 0x216   : > { %1460 = vmatpush1.bf16.msra.mxu1 %v4436_v11  ;;  %1533 = vmatpush1.bf16.msra.mxu0 %v4439_v12 }
 0x217   : > { %1461 = vmatprep.subr.bf16.mxu1 %v4444_v13  ;;  %1534 = vmatprep.subr.bf16.mxu0 %v4447_v15 }
 0x218   : > { %1367 = vmatprep.mubr.bf16.mxu1 %v5070_v40  ;;  %1440 = vmatprep.mubr.bf16.mxu0 %v5070_v40 }
 0x21a   : > { %1462 = vmatpush1.bf16.msra.mxu1 %v4442_v16  ;;  %1535 = vmatpush1.bf16.msra.mxu0 %v4445_v17 }
 0x21b   : > { %1463 = vmatprep.subr.bf16.mxu1 %v4450_v18  ;;  %1536 = vmatprep.subr.bf16.mxu0 %v4453_v19 }
 0x21d   : > { %1368 = vmatmul.mubr.bf16.gmra.mrb[28].mxu1 %v5456_v52  ;;  %1441 = vmatmul.mubr.bf16.gmra.mrb[36].mxu0 %v5456_v52 }
 0x21e   : > { %1464 = vmatpush1.bf16.msra.mxu1 %v4448_v20  ;;  %1537 = vmatpush1.bf16.msra.mxu0 %v4451_v21 }
 0x21f   : > { %1465 = vmatprep.subr.bf16.mxu1 %v4456_v22  ;;  %1538 = vmatprep.subr.bf16.mxu0 %v4459_v23 }
 0x220   : > { %1483 = vmatprep.mubr.bf16.mxu1 %v5070_v40  ;;  %1556 = vmatprep.mubr.bf16.mxu0 %v5070_v40 }
 0x222   : > { %1466 = vmatpush1.bf16.msra.mxu1 %v4454_v24  ;;  %1539 = vmatpush1.bf16.msra.mxu0 %v4457_v25 }
 0x225   : > { %1484 = vmatmul.mubr.bf16.vlgmr.msra.gmra.mrb[32].mxu1 %v5436_v14  ;;  %1557 = vmatmul.mubr.bf16.vlgmr.msra.gmra.mrb[40].mxu0 %v5436_v14  ;;  %v5071_v14 = vmov 1966171168  }
 0x226   : > { %1493 = vmatprep.mubr.bf16.mxu1 %v5070_v40  ;;  %1566 = vmatprep.mubr.bf16.mxu0 %v5070_v40 }
 0x22d   : > { %1494 = vmatmul.mubr.bf16.gmra.mrb[36].mxu1 %v5442_v26  ;;  %1567 = vmatmul.mubr.bf16.gmra.mrb[44].mxu0 %v5442_v26  ;;  %v1651_v26 = vunpack.c.l.s4 %v5071_v14 }
 0x22e   : > { %1503 = vmatprep.mubr.bf16.mxu1 %v5070_v40  ;;  %1576 = vmatprep.mubr.bf16.mxu0 %v5070_v40 }
 0x22f   : > { %v1652_v27 = vunpack.c.0.s8 %v1651_v26 }
 0x231   : > { %v5495_v28 = vsub.s32 %v1652_v27, %v5424_v42 }
 0x233   : > { %v1656_v30 = vrot.slane %v1645_v29, %v5495_v28  ;;  %v1663_v10 = vrot.slane %v1649_v63, %v5495_v28 }
 0x235   : > { %1504 = vmatmul.mubr.bf16.gmra.mrb[40].mxu1 %v5449_v37  ;;  %1577 = vmatmul.mubr.bf16.gmra.mrb[48].mxu0 %v5449_v37  ;;  %v1664_v31 = vcombine.high %v1656_v30, %v1656_v30  ;;  %v1672_v32 = vrot.slane %v1656_v30, %v5495_v28  ;;  %v1665_v22 = vcombine.high %v1663_v10, %v1663_v10 }
 0x236   : > { %1513 = vmatprep.mubr.bf16.mxu1 %v5070_v40  ;;  %1586 = vmatprep.mubr.bf16.mxu0 %v5070_v40  ;;  %v1679_v29 = vrot.slane %v1663_v10, %v5495_v28 }
 0x237   : > { %v1686_v33 = vrot.slane %v1664_v31, %v5495_v28  ;;  %v1694_v34 = vcombine.high %v1672_v32, %v1672_v32  ;;  %v1723_v36 = vpack.i.b16 %v1672_v32, %v1672_v32 }
 0x239   : > { %v1696_v35 = vcombine.high %v1686_v33, %v1686_v33  ;;  %v1737_v37 = vpack.i.b16 %v1694_v34, %v1694_v34  ;;  %v1730_v38 = vpack.i.b16 %v1686_v33, %v1686_v33  ;;  %v5501_v42 = vrot.slane %v1723_v36, %v5427_v45 }
 0x23a   : > { %v5547_v34 = vrot.slane %v1665_v22, %v5495_v28 }
 0x23b   : > { %v1744_v39 = vpack.i.b16 %v1696_v35, %v1696_v35  ;;  %v5504_v48 = vrot.slane %v1737_v37, %v5427_v45  ;;  %v5507_v51 = vrot.slane %v1730_v38, %v5427_v45 }
 0x23d   : > { %1514 = vmatmul.mubr.bf16.gmra.mrb[44].mxu1 %v5456_v52  ;;  %1587 = vmatmul.mubr.bf16.gmra.mrb[52].mxu0 %v5456_v52  ;;  %v5510_v52 = vrot.slane %v1744_v39, %v5427_v45 }
 0x23e   : > { %2295 = vmatprep.mubr.bf16.mxu1 %v5070_v40  ;;  %2336 = vmatprep.mubr.bf16.mxu0 %v5070_v40 }
 0x2b8   : > { %v1193_v43 = vpop.f32.mrb[0].mxu1  ;;  %v1266_v44 = vpop.f32.mrb[8].mxu0 }
 0x2b9   : > { %v1195_v46 = vpop.f32.mrb[1].mxu1  ;;  %v1268_v47 = vpop.f32.mrb[9].mxu0 }
 0x2ba   : > { %v1197_v49 = vpop.f32.mrb[2].mxu1  ;;  %v1270_v50 = vpop.f32.mrb[10].mxu0 }
 0x2bb   : > { %v1597_v53 = vpack.c.bf16 %v1197_v49, %v1193_v43  ;;  %v1599_v54 = vpack.c.bf16 %v1270_v50, %v1266_v44  ;;  %v1199_v55 = vpop.f32.mrb[3].mxu1  ;;  %v1272_v56 = vpop.f32.mrb[11].mxu0 }
 0x2bc   : > { %v1598_v57 = vpack.c.bf16 %v1199_v55, %v1195_v46  ;;  %v1600_v58 = vpack.c.bf16 %v1272_v56, %v1268_v47  ;;  %v5549_v46 = vcombine.high %v1679_v29, %v1679_v29  ;;  %v3872_v47 = vld.sshfl [vmem:[#allocation11 + $0x8] sm:$0x33 pattern:$0x75316420]  ;;  %v1751_v55 = vpack.i.b16 %v1679_v29, %v1679_v29 }
 0x2bd   : > { %v5513_v59 = vadd.bf16 %v5501_v42, %v1597_v53  ;;  %v5516_v60 = vadd.bf16 %v5504_v48, %v1599_v54 }
 0x2be   : > { %v5519_v61 = vadd.bf16 %v5507_v51, %v1598_v57  ;;  %v5522_v62 = vadd.bf16 %v5510_v52, %v1600_v58 }
 0x2bf   : > { %v3873_v0 = vmul.bf16 3216621497, %v5513_v59  ;;  %v3875_v1 = vmul.bf16 3216621497, %v5516_v60 }
 0x2c0   : > { %v3874_v2 = vmul.bf16 3216621497, %v5519_v61  ;;  %v3876_v3 = vmul.bf16 3216621497, %v5522_v62  ;;  %v1203_v4 = vpop.f32.mrb[4].mxu1  ;;  %v1276_v5 = vpop.f32.mrb[12].mxu0 }
 0x2c1   : > { %4573 = vpow.bf16 %v3873_v0  ;;  %v1205_v6 = vpop.f32.mrb[5].mxu1  ;;  %v1278_v7 = vpop.f32.mrb[13].mxu0  ;;  %v5565_v0 = vcombine.high %v5547_v34, %v5547_v34 }
 0x2c2   : > { %4575 = vpow.bf16 %v3875_v1  ;;  %v1207_v8 = vpop.f32.mrb[6].mxu1  ;;  %v1280_v9 = vpop.f32.mrb[14].mxu0 }
 0x2c3   : > { %4577 = vpow.bf16 %v3874_v2  ;;  %v1609_v11 = vpack.c.bf16 %v1207_v8, %v1203_v4  ;;  %v1611_v12 = vpack.c.bf16 %v1280_v9, %v1276_v5  ;;  %v1209_v13 = vpop.f32.mrb[7].mxu1  ;;  %v1282_v15 = vpop.f32.mrb[15].mxu0  ;;  %v1705_v4 = vcombine.high %v3872_v47, %v3872_v47 }
 0x2c4   : > { %4579 = vpow.bf16 %v3876_v3  ;;  %v1610_v16 = vpack.c.bf16 %v1209_v13, %v1205_v6  ;;  %v1612_v17 = vpack.c.bf16 %v1282_v15, %v1278_v7  ;;  %v5570_v7 = vrot.slane %v3872_v47, %v5495_v28 }
 0x2c5   : > { %v5530_v18 = vadd.bf16 %v5501_v42, %v1609_v11  ;;  %v5533_v19 = vadd.bf16 %v5504_v48, %v1611_v12  ;;  %v1765_v11 = vpack.i.b16 %v5549_v46, %v5549_v46 }
 0x2c6   : > { %v5536_v20 = vadd.bf16 %v5507_v51, %v1610_v16  ;;  %v5539_v21 = vadd.bf16 %v5510_v52, %v1612_v17  ;;  %v5577_v16 = vrot.slane %v1751_v55, %v5427_v45  ;;  %v1758_v17 = vpack.i.b16 %v5547_v34, %v5547_v34 }
 0x2c7   : > { %v3885_v23 = vmul.bf16 3216621497, %v5530_v18  ;;  %v3887_v24 = vmul.bf16 3216621497, %v5533_v19 }
 0x2c8   : > { %v3886_v25 = vmul.bf16 3216621497, %v5536_v20  ;;  %v3888_v14 = vmul.bf16 3216621497, %v5539_v21  ;;  %v1213_v26 = vpop.f32.mrb[8].mxu1  ;;  %v1286_v27 = vpop.f32.mrb[16].mxu0 }
 0x2c9   : > { %4581 = vpow.bf16 %v3885_v23  ;;  %v1215_v30 = vpop.f32.mrb[9].mxu1  ;;  %v1288_v31 = vpop.f32.mrb[17].mxu0 }
 0x2ca   : > { %4583 = vpow.bf16 %v3887_v24  ;;  %v1217_v32 = vpop.f32.mrb[10].mxu1  ;;  %v1290_v33 = vpop.f32.mrb[18].mxu0  ;;  %v1772_v24 = vpack.i.b16 %v5565_v0, %v5565_v0 }
 0x2cb   : > { %4585 = vpow.bf16 %v3886_v25  ;;  %v1621_v35 = vpack.c.bf16 %v1217_v32, %v1213_v26  ;;  %v1623_v36 = vpack.c.bf16 %v1290_v33, %v1286_v27  ;;  %v1219_v37 = vpop.f32.mrb[11].mxu1  ;;  %v1292_v38 = vpop.f32.mrb[19].mxu0  ;;  %v5584_v25 = vrot.slane %v1705_v4, %v5495_v28 }
 0x2cc   : > { %v4574_v39 = vpop.eup %4573  ;;  %4587 = vpow.bf16 %v3888_v14  ;;  %v1622_v43 = vpack.c.bf16 %v1219_v37, %v1215_v30  ;;  %v1624_v44 = vpack.c.bf16 %v1292_v38, %v1288_v31  ;;  %v2241_v14 = vand.u32 127, %v543_v41 }
 0x2cd   : > { %v4576_v49 = vpop.eup %4575  ;;  %v2046_v50 = vadd.bf16 1065369472, %v4574_v39  ;;  %v5552_v53 = vadd.bf16 %v5501_v42, %v1621_v35  ;;  %v5555_v54 = vadd.bf16 %v5504_v48, %v1623_v36  ;;  %v5589_v32 = vcombine.high %v5570_v7, %v5570_v7 }
 0x2ce   : > { %v4578_v56 = vpop.eup %4577  ;;  %v2048_v57 = vadd.bf16 1065369472, %v4576_v49  ;;  %v5558_v58 = vadd.bf16 %v5507_v51, %v1622_v43  ;;  %v5561_v63 = vadd.bf16 %v5510_v52, %v1624_v44  ;;  %vm2243_vm1 = vcmp.lt.s32.totalorder %v2241_v14, 64 }
 0x2cf   : > { %v4580_v1 = vpop.eup %4579  ;;  %4589 = vrcp.bf16 %v2046_v50  ;;  %v2047_v2 = vadd.bf16 1065369472, %v4578_v56  ;;  %v3897_v3 = vmul.bf16 3216621497, %v5552_v53  ;;  %v3899_v6 = vmul.bf16 3216621497, %v5555_v54 }
 0x2d0   : > { %4591 = vrcp.bf16 %v2048_v57  ;;  %v2049_v5 = vadd.bf16 1065369472, %v4580_v1  ;;  %v3898_v8 = vmul.bf16 3216621497, %v5558_v58  ;;  %v1223_v9 = vpop.f32.mrb[12].mxu1  ;;  %v1296_v10 = vpop.f32.mrb[20].mxu0  ;;  %v5607_v56 = vrot.slane %v1765_v11, %v5427_v45 }
 0x2d1   : > { %4593 = vrcp.bf16 %v2047_v2  ;;  %v3900_v12 = vmul.bf16 3216621497, %v5561_v63  ;;  %v1225_v13 = vpop.f32.mrb[13].mxu1  ;;  %v1298_v15 = vpop.f32.mrb[21].mxu0 }
 0x2d2   : > { %4595 = vrcp.bf16 %v2049_v5  ;;  %v1227_v22 = vpop.f32.mrb[14].mxu1  ;;  %v1300_v23 = vpop.f32.mrb[22].mxu0  ;;  %v5614_v5 = vrot.slane %v1772_v24, %v5427_v45  ;;  %v5072_v24 = vmov 0.0  }
 0x2d3   : > { %4597 = vpow.bf16 %v3897_v3  ;;  %v1633_v27 = vpack.c.bf16 %v1227_v22, %v1223_v9  ;;  %v1635_v29 = vpack.c.bf16 %v1300_v23, %v1296_v10  ;;  %v1229_v30 = vpop.f32.mrb[15].mxu1  ;;  %v1302_v31 = vpop.f32.mrb[23].mxu0 }
 0x2d4   : > { %v4582_v26 = vpop.eup %4581  ;;  %4599 = vpow.bf16 %v3899_v6  ;;  %v1634_v35 = vpack.c.bf16 %v1229_v30, %v1225_v13  ;;  %v1636_v36 = vpack.c.bf16 %v1302_v31, %v1298_v15  ;;  %v1779_v6 = vpack.i.b16 %v5570_v7, %v5570_v7 }
 0x2d5   : > { %v4584_v33 = vpop.eup %4583  ;;  %v2058_v34 = vadd.bf16 1065369472, %v4582_v26  ;;  %4601 = vpow.bf16 %v3898_v8  ;;  %v5592_v41 = vadd.bf16 %v5501_v42, %v1633_v27  ;;  %v5595_v38 = vadd.bf16 %v5504_v48, %v1635_v29 }
 0x2d6   : > { %v4586_v37 = vpop.eup %4585  ;;  %v2060_v28 = vadd.bf16 1065369472, %v4584_v33  ;;  %4603 = vpow.bf16 %v3900_v12  ;;  %v5598_v44 = vadd.bf16 %v5507_v51, %v1634_v35  ;;  %v5601_v46 = vadd.bf16 %v5510_v52, %v1636_v36 }
 0x2d7   : > { %v4588_v39 = vpop.eup %4587  ;;  %4605 = vrcp.bf16 %v2058_v34  ;;  %v2059_v43 = vadd.bf16 1065369472, %v4586_v37  ;;  %v3909_v49 = vmul.bf16 3216621497, %v5592_v41  ;;  %v3911_v50 = vmul.bf16 3216621497, %v5595_v38 }
 0x2d8   : > { %4607 = vrcp.bf16 %v2060_v28  ;;  %v2061_v47 = vadd.bf16 1065369472, %v4588_v39  ;;  %v3910_v42 = vmul.bf16 3216621497, %v5598_v44  ;;  %v1339_v48 = vpop.f32.mrb[16].mxu1  ;;  %v1412_v55 = vpop.f32.mrb[24].mxu0  ;;  %v5610_v51 = vrot.slane %v1758_v17, %v5427_v45 }
 0x2d9   : > { %4609 = vrcp.bf16 %v2059_v43  ;;  %v3912_v52 = vmul.bf16 3216621497, %v5601_v46  ;;  %v1341_v0 = vpop.f32.mrb[17].mxu1  ;;  %v1414_v1 = vpop.f32.mrb[25].mxu0  ;;  %v5620_v8 = vcombine.high %v5584_v25, %v5584_v25  ;;  %v1793_v15 = vpack.i.b16 %v5589_v32, %v5589_v32 }
 0x2da   : > { %v4590_v57 = vpop.eup %4589  ;;  %4611 = vrcp.bf16 %v2061_v47  ;;  %v1343_v3 = vpop.f32.mrb[18].mxu1  ;;  %v3921_v26 = vsel %vm2243_vm1, 1.0, %v5072_v24  ;;  %v1786_v31 = vpack.i.b16 %v5584_v25, %v5584_v25 }
 0x2db   : > { %v4592_v2 = vpop.eup %4591  ;;  %4613 = vpow.bf16 %v3909_v49  ;;  %v1416_v4 = vpop.f32.mrb[26].mxu0  ;;  %v1601_v10 = vpack.c.bf16 %v1343_v3, %v1339_v48  ;;  %v2095_v34 = vmul.bf16 1065369472, %v4590_v57  ;;  %v1800_v47 = vpack.i.b16 %v5620_v8, %v5620_v8 }
 0x2dc   : > { %v4594_v9 = vpop.eup %4593  ;;  %4615 = vpow.bf16 %v3911_v50  ;;  %v1603_v11 = vpack.c.bf16 %v1416_v4, %v1412_v55  ;;  %v1345_v12 = vpop.f32.mrb[19].mxu1  ;;  %v2099_v28 = vmul.bf16 1065369472, %v4592_v2 }
 0x2dd   : > { %v1418_v13 = vpop.f32.mrb[27].mxu0  ;;  %v4596_v17 = vpop.eup %4595  ;;  %4617 = vpow.bf16 %v3910_v42  ;;  %v1602_v22 = vpack.c.bf16 %v1345_v12, %v1341_v0  ;;  %v5626_v29 = vadd.bf16 %v5577_v16, %v1601_v10  ;;  %v2097_v37 = vmul.bf16 1065369472, %v4594_v9 }
 0x2de   : > { %v1604_v23 = vpack.c.bf16 %v1418_v13, %v1414_v1  ;;  %v4598_v27 = vpop.eup %4597  ;;  %4619 = vpow.bf16 %v3912_v52  ;;  %v5629_v30 = vadd.bf16 %v5607_v56, %v1603_v11  ;;  %v2101_v2 = vmul.bf16 1065369472, %v4596_v17 }
 0x2df   : > { %v4600_v33 = vpop.eup %4599  ;;  %v2070_v35 = vadd.bf16 1065369472, %v4598_v27  ;;  %v5634_v36 = vadd.bf16 %v5610_v51, %v1602_v22  ;;  %v3877_v42 = vmul.bf16 3216621497, %v5626_v29  ;;  %v2191_v1 = vmul.bf16 %v2097_v37, %v5519_v61 }
 0x2e0   : > { %v4602_v14 = vpop.eup %4601  ;;  %v2072_v39 = vadd.bf16 1065369472, %v4600_v33  ;;  %v5637_v43 = vadd.bf16 %v5614_v5, %v1604_v23  ;;  %v3879_v48 = vmul.bf16 3216621497, %v5629_v30  ;;  %v1349_v52 = vpop.f32.mrb[20].mxu1  ;;  %v2190_v4 = vmul.bf16 %v2095_v34, %v5513_v59 }
 0x2e1   : > { %v4604_v49 = vpop.eup %4603  ;;  %4621 = vrcp.bf16 %v2070_v35  ;;  %v2071_v50 = vadd.bf16 1065369472, %v4602_v14  ;;  %v1422_v0 = vpop.f32.mrb[28].mxu0  ;;  %v3878_v9 = vmul.bf16 3216621497, %v5634_v36  ;;  %v5648_v12 = vpack.c.bf16 %v3921_v26, %v3921_v26  ;;  %2263 = vmatprep.subr.bf16.mxu1 %v2191_v1 }
 0x2e2   : > { %v5643_v55 = vpop.eup %4605  ;;  %4623 = vrcp.bf16 %v2072_v39  ;;  %v2073_v57 = vadd.bf16 1065369472, %v4604_v49  ;;  %v1351_v10 = vpop.f32.mrb[21].mxu1  ;;  %v2192_v22 = vmul.bf16 %v2099_v28, %v5516_v60  ;;  %v3880_v23 = vmul.bf16 3216621497, %v5637_v43  ;;  %2264 = vmatpush1.bf16.msra.mxu1 %v2190_v4 }
 0x2e3   : > { %v4608_v3 = vpop.eup %4607  ;;  %4625 = vrcp.bf16 %v2071_v50  ;;  %v1424_v11 = vpop.f32.mrb[29].mxu0  ;;  %v2193_v61 = vmul.bf16 %v2101_v2, %v5522_v62  ;;  %v2119_v59 = vmul.bf16 1065369472, %v5643_v55  ;;  %v5671_v4 = vrot.slane %v1779_v6, %v5427_v45 }
 0x2e4   : > { %v4610_v13 = vpop.eup %4609  ;;  %4627 = vrcp.bf16 %v2073_v57  ;;  %v1353_v17 = vpop.f32.mrb[22].mxu1  ;;  %v2123_v14 = vmul.bf16 1065369472, %v4608_v3 }
 0x2e5   : > { %v1426_v24 = vpop.f32.mrb[30].mxu0  ;;  %v4612_v27 = vpop.eup %4611  ;;  %4629 = vpow.bf16 %v3877_v42  ;;  %v1613_v33 = vpack.c.bf16 %v1353_v17, %v1349_v52  ;;  %2304 = vmatprep.subr.bf16.mxu0 %v2193_v61  ;;  %v2202_v6 = vmul.bf16 %v2119_v59, %v5530_v18 }
 0x2e6   : > { %v1615_v34 = vpack.c.bf16 %v1426_v24, %v1422_v0  ;;  %v1355_v26 = vpop.f32.mrb[23].mxu1  ;;  %v1428_v35 = vpop.f32.mrb[31].mxu0  ;;  %4631 = vpow.bf16 %v3879_v48  ;;  %2305 = vmatpush1.bf16.msra.mxu0 %v2192_v22  ;;  %v2121_v22 = vmul.bf16 1065369472, %v4610_v13  ;;  %v5679_v24 = vrot.slane %v1793_v15, %v5427_v45 }
 0x2e7   : > { %v4614_v37 = vpop.eup %4613  ;;  %v1614_v60 = vpack.c.bf16 %v1355_v26, %v1351_v10  ;;  %v1616_v28 = vpack.c.bf16 %v1428_v35, %v1424_v11  ;;  %4633 = vpow.bf16 %v3878_v9  ;;  %v5655_v62 = vadd.bf16 %v5577_v16, %v1613_v33 }
 0x2e8   : > { %v4616_v39 = vpop.eup %4615  ;;  %v2082_v49 = vadd.bf16 1065369472, %v4614_v37  ;;  %v5658_v50 = vadd.bf16 %v5607_v56, %v1615_v34  ;;  %4635 = vpow.bf16 %v3880_v23  ;;  %v1359_v52 = vpop.f32.mrb[24].mxu1  ;;  %v2125_v23 = vmul.bf16 1065369472, %v4612_v27 }
 0x2e9   : > { %v4618_v42 = vpop.eup %4617  ;;  %v2084_v55 = vadd.bf16 1065369472, %v4616_v39  ;;  %v5661_v57 = vadd.bf16 %v5610_v51, %v1614_v60  ;;  %v5664_v48 = vadd.bf16 %v5614_v5, %v1616_v28  ;;  %v1432_v0 = vpop.f32.mrb[32].mxu0  ;;  %v3889_v3 = vmul.bf16 3216621497, %v5655_v62 }
 0x2ea   : > { %v4620_v1 = vpop.eup %4619  ;;  %4637 = vrcp.bf16 %v2082_v49  ;;  %v2083_v2 = vadd.bf16 1065369472, %v4618_v42  ;;  %v3891_v10 = vmul.bf16 3216621497, %v5658_v50  ;;  %v1361_v61 = vpop.f32.mrb[25].mxu1  ;;  %v2204_v33 = vmul.bf16 %v2123_v14, %v5533_v19 }
 0x2eb   : > { %4639 = vrcp.bf16 %v2084_v55  ;;  %v2085_v9 = vadd.bf16 1065369472, %v4620_v1  ;;  %v3890_v11 = vmul.bf16 3216621497, %v5661_v57  ;;  %v1434_v17 = vpop.f32.mrb[33].mxu0  ;;  %v1363_v26 = vpop.f32.mrb[26].mxu1  ;;  %v2203_v37 = vmul.bf16 %v2121_v22, %v5536_v20 }
 0x2ec   : > { %4641 = vrcp.bf16 %v2083_v2  ;;  %v4622_v7 = vpop.eup %4621  ;;  %v3892_v34 = vmul.bf16 3216621497, %v5664_v48  ;;  %v1436_v35 = vpop.f32.mrb[34].mxu0  ;;  %v2205_v60 = vmul.bf16 %v2125_v23, %v5539_v21  ;;  %v1625_v18 = vpack.c.bf16 %v1363_v26, %v1359_v52 }
 0x2ed   : > { %4643 = vrcp.bf16 %v2085_v9  ;;  %v4624_v13 = vpop.eup %4623  ;;  %v2143_v27 = vmul.bf16 1065369472, %v4622_v7  ;;  %v1365_v32 = vpop.f32.mrb[27].mxu1  ;;  %v1627_v59 = vpack.c.bf16 %v1436_v35, %v1432_v0  ;;  %2265 = vmatprep.subr.bf16.mxu1 %v2203_v37  ;;  %v5690_v20 = vrot.slane %v1786_v31, %v5427_v45 }
 0x2ee   : > { %4645 = vpow.bf16 %v3889_v3  ;;  %v1438_v15 = vpop.f32.mrb[35].mxu0  ;;  %v4626_v28 = vpop.eup %4625  ;;  %v2147_v39 = vmul.bf16 1065369472, %v4624_v13  ;;  %2306 = vmatprep.subr.bf16.mxu0 %v2205_v60  ;;  %v1626_v14 = vpack.c.bf16 %v1365_v32, %v1361_v61  ;;  %2266 = vmatpush1.bf16.msra.mxu1 %v2202_v6  ;;  %v5693_v42 = vadd.bf16 %v5577_v16, %v1625_v18 }
 0x2ef   : > { %4647 = vpow.bf16 %v3891_v10  ;;  %v4628_v19 = vpop.eup %4627  ;;  %v1628_v49 = vpack.c.bf16 %v1438_v15, %v1434_v17  ;;  %2307 = vmatpush1.bf16.msra.mxu0 %v2204_v33  ;;  %v5696_v55 = vadd.bf16 %v5607_v56, %v1627_v59  ;;  %v5702_v1 = vrot.slane %v1800_v47, %v5427_v45 }
 0x2f0   : > { %4649 = vpow.bf16 %v3890_v11  ;;  %v4630_v21 = vpop.eup %4629  ;;  %v1369_v52 = vpop.f32.mrb[28].mxu1  ;;  %v2214_v31 = vmul.bf16 %v2143_v27, %v5552_v53  ;;  %v5706_v3 = vadd.bf16 %v5610_v51, %v1626_v14  ;;  %v2145_v9 = vmul.bf16 1065369472, %v4626_v28 }
 0x2f1   : > { %4651 = vpow.bf16 %v3892_v34  ;;  %v1442_v0 = vpop.f32.mrb[36].mxu0  ;;  %v4632_v25 = vpop.eup %4631  ;;  %v2050_v2 = vadd.bf16 1065369472, %v4630_v21  ;;  %v2216_v23 = vmul.bf16 %v2147_v39, %v5555_v54  ;;  %v3901_v17 = vmul.bf16 3216621497, %v5693_v42 }
 0x2f2   : > { %v1371_v10 = vpop.f32.mrb[29].mxu1  ;;  %v1444_v11 = vpop.f32.mrb[37].mxu0  ;;  %v2052_v61 = vadd.bf16 1065369472, %v4632_v25  ;;  %v5711_v8 = vadd.bf16 %v5614_v5, %v1628_v49  ;;  %v3903_v53 = vmul.bf16 3216621497, %v5696_v55  ;;  %v2215_v34 = vmul.bf16 %v2145_v9, %v5558_v58 }
 0x2f3   : > { %v4634_v22 = vpop.eup %4633  ;;  %4653 = vrcp.bf16 %v2050_v2  ;;  %v3902_v7 = vmul.bf16 3216621497, %v5706_v3  ;;  %v2149_v26 = vmul.bf16 1065369472, %v4628_v19  ;;  %v1373_v54 = vpop.f32.mrb[30].mxu1 }
 0x2f4   : > { %v4636_v45 = vpop.eup %4635  ;;  %v2051_v47 = vadd.bf16 1065369472, %v4634_v22  ;;  %4655 = vrcp.bf16 %v2052_v61  ;;  %v1446_v35 = vpop.f32.mrb[38].mxu0  ;;  %v1637_v37 = vpack.c.bf16 %v1373_v54, %v1369_v52  ;;  %v3904_v39 = vmul.bf16 3216621497, %v5711_v8  ;;  %2267 = vmatprep.subr.bf16.mxu1 %v2215_v34 }
 0x2f5   : > { %v4638_v6 = vpop.eup %4637  ;;  %v2053_v33 = vadd.bf16 1065369472, %v4636_v45  ;;  %v1639_v60 = vpack.c.bf16 %v1446_v35, %v1442_v0  ;;  %v1375_v32 = vpop.f32.mrb[31].mxu1  ;;  %v2217_v18 = vmul.bf16 %v2149_v26, %v5561_v63  ;;  %2268 = vmatpush1.bf16.msra.mxu1 %v2214_v31 }
 0x2f6   : > { %v4640_v13 = vpop.eup %4639  ;;  %v2167_v27 = vmul.bf16 1065369472, %v4638_v6  ;;  %4657 = vrcp.bf16 %v2051_v47  ;;  %v1448_v15 = vpop.f32.mrb[39].mxu0  ;;  %v1638_v59 = vpack.c.bf16 %v1375_v32, %v1371_v10  ;;  %v5719_v19 = vadd.bf16 %v5577_v16, %v1637_v37 }
 0x2f7   : > { %v4642_v28 = vpop.eup %4641  ;;  %4659 = vrcp.bf16 %v2053_v33  ;;  %v2171_v58 = vmul.bf16 1065369472, %v4640_v13  ;;  %v5722_v49 = vadd.bf16 %v5607_v56, %v1639_v60  ;;  %2308 = vmatprep.subr.bf16.mxu0 %v2217_v18  ;;  %v1640_v63 = vpack.c.bf16 %v1448_v15, %v1444_v11 }
 0x2f8   : > { %v4644_v14 = vpop.eup %4643  ;;  %4661 = vpow.bf16 %v3901_v17  ;;  %v2226_v52 = vmul.bf16 %v2167_v27, %v5592_v41  ;;  %v5726_v0 = vadd.bf16 %v5610_v51, %v1638_v59  ;;  %v1485_v25 = vpop.f32.mrb[32].mxu1  ;;  %2309 = vmatpush1.bf16.msra.mxu0 %v2216_v23  ;;  %v3913_v16 = vmul.bf16 3216621497, %v5719_v19 }
 0x2f9   : > { %v4646_v21 = vpop.eup %4645  ;;  %4663 = vpow.bf16 %v3903_v53  ;;  %v1558_v2 = vpop.f32.mrb[40].mxu0  ;;  %v3915_v56 = vmul.bf16 3216621497, %v5722_v49  ;;  %v5732_v61 = vadd.bf16 %v5614_v5, %v1640_v63  ;;  %v2169_v47 = vmul.bf16 1065369472, %v4642_v28 }
 0x2fa   : > { %v4648_v9 = vpop.eup %4647  ;;  %v2062_v10 = vadd.bf16 1065369472, %v4646_v21  ;;  %4665 = vpow.bf16 %v3902_v7  ;;  %v3914_v41 = vmul.bf16 3216621497, %v5726_v0  ;;  %v1487_v51 = vpop.f32.mrb[33].mxu1  ;;  %v2228_v23 = vmul.bf16 %v2171_v58, %v5595_v38 }
 0x2fb   : > { %v4650_v31 = vpop.eup %4649  ;;  %v2064_v22 = vadd.bf16 1065369472, %v4648_v9  ;;  %4667 = vpow.bf16 %v3904_v39  ;;  %v1560_v11 = vpop.f32.mrb[41].mxu0  ;;  %v2173_v53 = vmul.bf16 1065369472, %v4644_v14  ;;  %v2227_v26 = vmul.bf16 %v2169_v47, %v5598_v44 }
 0x2fc   : > { %v4652_v17 = vpop.eup %4651  ;;  %4669 = vrcp.bf16 %v2062_v10  ;;  %v2063_v45 = vadd.bf16 1065369472, %v4650_v31  ;;  %v3916_v6 = vmul.bf16 3216621497, %v5732_v61  ;;  %v1489_v33 = vpop.f32.mrb[34].mxu1 }
 0x2fd   : > { %4671 = vrcp.bf16 %v2064_v22  ;;  %v2065_v7 = vadd.bf16 1065369472, %v4652_v17  ;;  %v1562_v34 = vpop.f32.mrb[42].mxu0  ;;  %v2229_v5 = vmul.bf16 %v2173_v53, %v5601_v46  ;;  %v1605_v54 = vpack.c.bf16 %v1489_v33, %v1485_v25  ;;  %v1491_v35 = vpop.f32.mrb[35].mxu1  ;;  %2269 = vmatprep.subr.bf16.mxu1 %v2227_v26 }
 0x2fe   : > { %4673 = vrcp.bf16 %v2063_v45  ;;  %v1564_v13 = vpop.f32.mrb[43].mxu0  ;;  %v4654_v27 = vpop.eup %4653  ;;  %v1607_v37 = vpack.c.bf16 %v1562_v34, %v1558_v2  ;;  %v1606_v60 = vpack.c.bf16 %v1491_v35, %v1487_v51  ;;  %2270 = vmatpush1.bf16.msra.mxu1 %v2226_v52 }
 0x2ff   : > { %4675 = vrcp.bf16 %v2065_v7  ;;  %v1608_v32 = vpack.c.bf16 %v1564_v13, %v1560_v11  ;;  %v4656_v38 = vpop.eup %4655  ;;  %v2103_v15 = vmul.bf16 1065369472, %v4654_v27  ;;  %2310 = vmatprep.subr.bf16.mxu0 %v2229_v5  ;;  %v5739_v28 = vadd.bf16 %v5671_v4, %v1605_v54 }
 0x300   : > { %4677 = vpow.bf16 %v3913_v16  ;;  %v2107_v39 = vmul.bf16 1065369472, %v4656_v38  ;;  %2311 = vmatpush1.bf16.msra.mxu0 %v2228_v23  ;;  %v5742_v46 = vadd.bf16 %v5679_v24, %v1607_v37  ;;  %v5745_v18 = vadd.bf16 %v5690_v20, %v1606_v60  ;;  %v1495_v59 = vpop.f32.mrb[36].mxu1  ;;  %v1568_v14 = vpop.f32.mrb[44].mxu0 }
 0x301   : > { %v4658_v44 = vpop.eup %4657  ;;  %4679 = vpow.bf16 %v3915_v56  ;;  %v2194_v21 = vmul.bf16 %v2103_v15, %v5626_v29  ;;  %v3881_v63 = vmul.bf16 3216621497, %v5739_v28  ;;  %v5750_v25 = vadd.bf16 %v5702_v1, %v1608_v32  ;;  %v1497_v2 = vpop.f32.mrb[37].mxu1  ;;  %3922 = vmatmul.mubr.msk.bf16.vlgmr.msra.gmra.mrb[48].mxu1 %vm2259_vm2, %v5648_v12 }
 0x302   : > { %v4660_v58 = vpop.eup %4659  ;;  %4681 = vpow.bf16 %v3914_v41  ;;  %v1570_v52 = vpop.f32.mrb[45].mxu0  ;;  %v2196_v10 = vmul.bf16 %v2107_v39, %v5629_v30  ;;  %v3883_v16 = vmul.bf16 3216621497, %v5742_v46  ;;  %v3882_v56 = vmul.bf16 3216621497, %v5745_v18  ;;  %2377 = vmatprep.mubr.bf16.mxu1 %v5070_v40 }
 0x303   : > { %v4662_v9 = vpop.eup %4661  ;;  %4683 = vpow.bf16 %v3916_v6  ;;  %v1499_v31 = vpop.f32.mrb[38].mxu1  ;;  %v3884_v41 = vmul.bf16 3216621497, %v5750_v25  ;;  %3923 = vmatmul.mubr.msk.bf16.vlgmr.msra.gmra.mrb[56].mxu0 %vm2259_vm2, %v5648_v12  ;;  %v2105_v11 = vmul.bf16 1065369472, %v4658_v44 }
 0x304   : > { %v1572_v22 = vpop.f32.mrb[46].mxu0  ;;  %v4664_v51 = vpop.eup %4663  ;;  %v2074_v29 = vadd.bf16 1065369472, %v4662_v9  ;;  %4685 = vpow.bf16 %v3881_v63  ;;  %v2109_v45 = vmul.bf16 1065369472, %v4660_v58  ;;  %v1617_v47 = vpack.c.bf16 %v1499_v31, %v1495_v59  ;;  %2418 = vmatprep.mubr.bf16.mxu0 %v5070_v40 }
 0x305   : > { %v4666_v30 = vpop.eup %4665  ;;  %v2076_v17 = vadd.bf16 1065369472, %v4664_v51  ;;  %4687 = vpow.bf16 %v3883_v16  ;;  %v1501_v53 = vpop.f32.mrb[39].mxu1  ;;  %v2195_v33 = vmul.bf16 %v2105_v11, %v5634_v36  ;;  %v1619_v34 = vpack.c.bf16 %v1572_v22, %v1568_v14 }
 0x306   : > { %v1574_v23 = vpop.f32.mrb[47].mxu0  ;;  %v4668_v7 = vpop.eup %4667  ;;  %4689 = vrcp.bf16 %v2074_v29  ;;  %v2075_v6 = vadd.bf16 1065369472, %v4666_v30  ;;  %v2197_v54 = vmul.bf16 %v2109_v45, %v5637_v43  ;;  %v5765_v35 = vadd.bf16 %v5671_v4, %v1617_v47 }
 0x307   : > { %v4670_v26 = vpop.eup %4669  ;;  %4691 = vrcp.bf16 %v2076_v17  ;;  %v2077_v5 = vadd.bf16 1065369472, %v4668_v7  ;;  %2345 = vmatprep.subr.bf16.mxu1 %v2195_v33  ;;  %v5768_v37 = vadd.bf16 %v5679_v24, %v1619_v34  ;;  %v1618_v60 = vpack.c.bf16 %v1501_v53, %v1497_v2 }
 0x308   : > { %v4672_v13 = vpop.eup %4671  ;;  %v2127_v27 = vmul.bf16 1065369472, %v4670_v26  ;;  %4693 = vrcp.bf16 %v2075_v6  ;;  %2386 = vmatprep.subr.bf16.mxu0 %v2197_v54  ;;  %2346 = vmatpush1.bf16.msra.mxu1 %v2194_v21  ;;  %v3893_v36 = vmul.bf16 3216621497, %v5765_v35  ;;  %v1620_v15 = vpack.c.bf16 %v1574_v23, %v1570_v52  ;;  %v1505_v43 = vpop.f32.mrb[40].mxu1 }
 0x309   : > { %v4674_v32 = vpop.eup %4673  ;;  %v2131_v38 = vmul.bf16 1065369472, %v4672_v13  ;;  %4695 = vrcp.bf16 %v2077_v5  ;;  %v1578_v44 = vpop.f32.mrb[48].mxu0  ;;  %2387 = vmatpush1.bf16.msra.mxu0 %v2196_v10  ;;  %v3895_v14 = vmul.bf16 3216621497, %v5768_v37  ;;  %v5774_v58 = vadd.bf16 %v5690_v20, %v1618_v60 }
 0x30a   : > { %v4676_v39 = vpop.eup %4675  ;;  %v2206_v59 = vmul.bf16 %v2127_v27, %v5655_v62  ;;  %4697 = vpow.bf16 %v3882_v56  ;;  %v1507_v63 = vpop.f32.mrb[41].mxu1  ;;  %v5778_v52 = vadd.bf16 %v5702_v1, %v1620_v15  ;;  %v2129_v16 = vmul.bf16 1065369472, %v4674_v32 }
 0x30b   : > { %v1580_v2 = vpop.f32.mrb[49].mxu0  ;;  %v4678_v9 = vpop.eup %4677  ;;  %v2208_v21 = vmul.bf16 %v2131_v38, %v5658_v50  ;;  %4699 = vpow.bf16 %v3884_v41  ;;  %v3894_v10 = vmul.bf16 3216621497, %v5774_v58  ;;  %v2133_v51 = vmul.bf16 1065369472, %v4676_v39 }
 0x30c   : > { %v1509_v31 = vpop.f32.mrb[42].mxu1  ;;  %v1582_v22 = vpop.f32.mrb[50].mxu0  ;;  %v2086_v56 = vadd.bf16 1065369472, %v4678_v9  ;;  %4701 = vpow.bf16 %v3893_v36  ;;  %v3896_v30 = vmul.bf16 3216621497, %v5778_v52  ;;  %v2207_v50 = vmul.bf16 %v2129_v16, %v5661_v57 }
 0x30d   : > { %v4680_v62 = vpop.eup %4679  ;;  %4703 = vpow.bf16 %v3895_v14  ;;  %v1511_v41 = vpop.f32.mrb[43].mxu1  ;;  %v2209_v53 = vmul.bf16 %v2133_v51, %v5664_v48  ;;  %v1629_v23 = vpack.c.bf16 %v1509_v31, %v1505_v43  ;;  %v1631_v33 = vpack.c.bf16 %v1582_v22, %v1578_v44 }
 0x30e   : > { %v4682_v29 = vpop.eup %4681  ;;  %v2088_v11 = vadd.bf16 1065369472, %v4680_v62  ;;  %v1584_v17 = vpop.f32.mrb[51].mxu0  ;;  %4705 = vrcp.bf16 %v2086_v56  ;;  %2347 = vmatprep.subr.bf16.mxu1 %v2207_v50  ;;  %v1630_v34 = vpack.c.bf16 %v1511_v41, %v1507_v63 }
 0x30f   : > { %v4684_v45 = vpop.eup %4683  ;;  %v2087_v47 = vadd.bf16 1065369472, %v4682_v29  ;;  %2388 = vmatprep.subr.bf16.mxu0 %v2209_v53  ;;  %2348 = vmatpush1.bf16.msra.mxu1 %v2206_v59  ;;  %v5785_v57 = vadd.bf16 %v5671_v4, %v1629_v23  ;;  %v1632_v54 = vpack.c.bf16 %v1584_v17, %v1580_v2  ;;  %v5788_v48 = vadd.bf16 %v5679_v24, %v1631_v33 }
 0x310   : > { %v4686_v7 = vpop.eup %4685  ;;  %4707 = vrcp.bf16 %v2088_v11  ;;  %v2089_v6 = vadd.bf16 1065369472, %v4684_v45  ;;  %2389 = vmatpush1.bf16.msra.mxu0 %v2208_v21  ;;  %v5791_v60 = vadd.bf16 %v5690_v20, %v1630_v34  ;;  %v1515_v32 = vpop.f32.mrb[44].mxu1 }
 0x311   : > { %v4688_v26 = vpop.eup %4687  ;;  %4709 = vrcp.bf16 %v2087_v47  ;;  %v2054_v5 = vadd.bf16 1065369472, %v4686_v7  ;;  %v1588_v38 = vpop.f32.mrb[52].mxu0  ;;  %v3905_v43 = vmul.bf16 3216621497, %v5785_v57  ;;  %v5796_v2 = vadd.bf16 %v5702_v1, %v1632_v54 }
 0x312   : > { %v4690_v13 = vpop.eup %4689  ;;  %4711 = vrcp.bf16 %v2089_v6  ;;  %v2056_v27 = vadd.bf16 1065369472, %v4688_v26  ;;  %v1517_v44 = vpop.f32.mrb[45].mxu1  ;;  %v3907_v63 = vmul.bf16 3216621497, %v5788_v48 }
 0x313   : > { %v4692_v36 = vpop.eup %4691  ;;  %v2151_v15 = vmul.bf16 1065369472, %v4690_v13  ;;  %4713 = vrcp.bf16 %v2054_v5  ;;  %v1590_v39 = vpop.f32.mrb[53].mxu0  ;;  %v3906_v16 = vmul.bf16 3216621497, %v5791_v60 }
 0x314   : > { %v4694_v59 = vpop.eup %4693  ;;  %v2155_v14 = vmul.bf16 1065369472, %v4692_v36  ;;  %4715 = vrcp.bf16 %v2056_v27  ;;  %v1519_v22 = vpop.f32.mrb[46].mxu1  ;;  %v3908_v26 = vmul.bf16 3216621497, %v5796_v2 }
 0x315   : > { %v4696_v9 = vpop.eup %4695  ;;  %v2218_v21 = vmul.bf16 %v2151_v15, %v5693_v42  ;;  %4717 = vpow.bf16 %v3894_v10  ;;  %v2153_v31 = vmul.bf16 1065369472, %v4694_v59  ;;  %v1592_v62 = vpop.f32.mrb[54].mxu0  ;;  %v1641_v11 = vpack.c.bf16 %v1519_v22, %v1515_v32 }
 0x316   : > { %v4698_v56 = vpop.eup %4697  ;;  %v2220_v51 = vmul.bf16 %v2155_v14, %v5696_v55  ;;  %4719 = vpow.bf16 %v3896_v30  ;;  %v2157_v29 = vmul.bf16 1065369472, %v4696_v9  ;;  %v1521_v50 = vpop.f32.mrb[47].mxu1  ;;  %v1643_v42 = vpack.c.bf16 %v1592_v62, %v1588_v38 }
 0x317   : > { %v1594_v41 = vpop.f32.mrb[55].mxu0  ;;  %v4700_v17 = vpop.eup %4699  ;;  %v2055_v45 = vadd.bf16 1065369472, %v4698_v56  ;;  %4721 = vpow.bf16 %v3905_v43  ;;  %v2219_v47 = vmul.bf16 %v2153_v31, %v5706_v3  ;;  %v5804_v7 = vadd.bf16 %v5671_v4, %v1641_v11 }
 0x318   : > { %v4702_v10 = vpop.eup %4701  ;;  %v2057_v53 = vadd.bf16 1065369472, %v4700_v17  ;;  %4723 = vpow.bf16 %v3907_v63  ;;  %v2221_v23 = vmul.bf16 %v2157_v29, %v5711_v8  ;;  %v5807_v6 = vadd.bf16 %v5679_v24, %v1643_v42 }
 0x319   : > { %v4704_v55 = vpop.eup %4703  ;;  %4725 = vrcp.bf16 %v2055_v45  ;;  %v2066_v30 = vadd.bf16 1065369472, %v4702_v10  ;;  %2349 = vmatprep.subr.bf16.mxu1 %v2219_v47  ;;  %v1642_v33 = vpack.c.bf16 %v1521_v50, %v1517_v44  ;;  %v1644_v5 = vpack.c.bf16 %v1594_v41, %v1590_v39 }
 0x31a   : > { %v4706_v34 = vpop.eup %4705  ;;  %4727 = vrcp.bf16 %v2057_v53  ;;  %v2068_v3 = vadd.bf16 1065369472, %v4704_v55  ;;  %2390 = vmatprep.subr.bf16.mxu0 %v2221_v23  ;;  %2350 = vmatpush1.bf16.msra.mxu1 %v2218_v21  ;;  %v3917_v4 = vmul.bf16 3216621497, %v5804_v7  ;;  %v3919_v27 = vmul.bf16 3216621497, %v5807_v6 }
 0x31b   : > { %v4708_v8 = vpop.eup %4707  ;;  %4729 = vrcp.bf16 %v2066_v30  ;;  %2391 = vmatpush1.bf16.msra.mxu0 %v2220_v51  ;;  %v5812_v54 = vadd.bf16 %v5690_v20, %v1642_v33  ;;  %v2175_v24 = vmul.bf16 1065369472, %v4706_v34  ;;  %v5816_v32 = vadd.bf16 %v5702_v1, %v1644_v5 }
 0x31c   : > { %v4710_v13 = vpop.eup %4709  ;;  %4731 = vrcp.bf16 %v2068_v3  ;;  %v2179_v36 = vmul.bf16 1065369472, %v4708_v8 }
 0x31d   : > { %v4712_v38 = vpop.eup %4711  ;;  %4733 = vpow.bf16 %v3906_v16  ;;  %v3918_v15 = vmul.bf16 3216621497, %v5812_v54  ;;  %v2177_v43 = vmul.bf16 1065369472, %v4710_v13  ;;  %v3920_v39 = vmul.bf16 3216621497, %v5816_v32 }
 0x31e   : > { %v4714_v44 = vpop.eup %4713  ;;  %4735 = vpow.bf16 %v3908_v26  ;;  %v2181_v20 = vmul.bf16 1065369472, %v4712_v38  ;;  %v2230_v9 = vmul.bf16 %v2175_v24, %v5719_v19  ;;  %v2232_v16 = vmul.bf16 %v2179_v36, %v5722_v49 }
 0x31f   : > { %v4716_v59 = vpop.eup %4715  ;;  %4737 = vpow.bf16 %v3917_v4  ;;  %v2231_v14 = vmul.bf16 %v2177_v43, %v5726_v0  ;;  %v2111_v51 = vmul.bf16 1065369472, %v4714_v44 }
 0x320   : > { %v4718_v63 = vpop.eup %4717  ;;  %4739 = vpow.bf16 %v3919_v27  ;;  %v2233_v1 = vmul.bf16 %v2181_v20, %v5732_v61  ;;  %v2115_v61 = vmul.bf16 1065369472, %v4716_v59 }
 0x321   : > { %v4720_v21 = vpop.eup %4719  ;;  %v2067_v31 = vadd.bf16 1065369472, %v4718_v63  ;;  %4741 = vpow.bf16 %v3918_v15  ;;  %2351 = vmatprep.subr.bf16.mxu1 %v2231_v14  ;;  %v2198_v42 = vmul.bf16 %v2111_v51, %v5739_v28 }
 0x322   : > { %v4722_v22 = vpop.eup %4721  ;;  %v2069_v62 = vadd.bf16 1065369472, %v4720_v21  ;;  %4743 = vpow.bf16 %v3920_v39  ;;  %2392 = vmatprep.subr.bf16.mxu0 %v2233_v1  ;;  %2352 = vmatpush1.bf16.msra.mxu1 %v2230_v9  ;;  %v2200_v23 = vmul.bf16 %v2115_v61, %v5742_v46  ;;  %v4464_v61 = vld [vmem:[#allocation12 + $0x80] sm:$0xff]  }
 0x323   : > { %v4724_v56 = vpop.eup %4723  ;;  %4745 = vrcp.bf16 %v2067_v31  ;;  %2393 = vmatpush1.bf16.msra.mxu0 %v2232_v16  ;;  %v2078_v19 = vadd.bf16 1065369472, %v4722_v22 }
 0x324   : > { %v4726_v0 = vpop.eup %4725  ;;  %4747 = vrcp.bf16 %v2069_v62  ;;  %v2080_v11 = vadd.bf16 1065369472, %v4724_v56 }
 0x325   : > { %v4728_v29 = vpop.eup %4727  ;;  %3924 = vmatmul.mubr.msk.bf16.vlgmr.msra.gmra.mrb[52].mxu1 %vm2259_vm2, %v5648_v12  ;;  %v2113_v49 = vmul.bf16 1065369472, %v4726_v0  ;;  %4749 = vrcp.bf16 %v2078_v19  ;;  %v4461_v19 = vld [vmem:[#allocation12 + $0x40] sm:$0xff]  }
 0x326   : > { %v4730_v50 = vpop.eup %4729  ;;  %3925 = vmatmul.mubr.msk.bf16.vlgmr.msra.gmra.mrb[60].mxu0 %vm2259_vm2, %v5648_v12  ;;  %v2117_v41 = vmul.bf16 1065369472, %v4728_v29  ;;  %2459 = vmatprep.mubr.bf16.mxu1 %v5070_v40  ;;  %4751 = vrcp.bf16 %v2080_v11  ;;  %v4463_v29 = vld [vmem:[#allocation12 + $0xc0] sm:$0xff]   ;;  %v4465_v11 = vld [vmem:[#allocation12 + $0x48] sm:$0xff]  }
 0x327   : > { %v4732_v17 = vpop.eup %4731  ;;  %v2199_v45 = vmul.bf16 %v2113_v49, %v5745_v18  ;;  %2500 = vmatprep.mubr.bf16.mxu0 %v5070_v40  ;;  %v2135_v5 = vmul.bf16 1065369472, %v4730_v50  ;;  %v4467_v49 = vld [vmem:[#allocation12 + $0xc8] sm:$0xff]   ;;  %v4470_v50 = vld [vmem:[#allocation12 + $0x10] sm:$0xff]  }
 0x328   : > { %v4734_v47 = vpop.eup %4733  ;;  %v2201_v10 = vmul.bf16 %v2117_v41, %v5750_v25  ;;  %v2139_v4 = vmul.bf16 1065369472, %v4732_v17  ;;  %v4472_v41 = vld [vmem:[#allocation12 + $0x90] sm:$0xff]   ;;  %v4473_v17 = vld [vmem:[#allocation12 + $0x58] sm:$0xff]  }
 0x329   : > { %v4736_v53 = vpop.eup %4735  ;;  %v2079_v55 = vadd.bf16 1065369472, %v4734_v47  ;;  %2427 = vmatprep.subr.bf16.mxu1 %v2199_v45  ;;  %v2210_v38 = vmul.bf16 %v2135_v5, %v5765_v35  ;;  %v4475_v45 = vld [vmem:[#allocation12 + $0xd8] sm:$0xff]  }
 0x32a   : > { %v4738_v30 = vpop.eup %4737  ;;  %v2081_v33 = vadd.bf16 1065369472, %v4736_v53  ;;  %2468 = vmatprep.subr.bf16.mxu0 %v2201_v10  ;;  %2428 = vmatpush1.bf16.msra.mxu1 %v2198_v42  ;;  %v2212_v43 = vmul.bf16 %v2139_v4, %v5768_v37  ;;  %v4474_v47 = vld [vmem:[#allocation12 + $0x18] sm:$0xff]   ;;  %v4477_v42 = vld [vmem:[#allocation12 + $0x60] sm:$0xff]  }
 0x32b   : > { %v4740_v34 = vpop.eup %4739  ;;  %4753 = vrcp.bf16 %v2079_v55  ;;  %v2090_v18 = vadd.bf16 1065369472, %v4738_v30  ;;  %2469 = vmatpush1.bf16.msra.mxu0 %v2200_v23  ;;  %v4479_v10 = vld [vmem:[#allocation12 + $0xe0] sm:$0xff]   ;;  %v4481_v55 = vld [vmem:[#allocation12 + $0x68] sm:$0xff]   ;;  %v4491_v5 = vld [vmem:[#allocation12 + $0xf8] sm:$0xff]  }
 0x32c   : > { %v4742_v40 = vpop.eup %4741  ;;  %4755 = vrcp.bf16 %v2081_v33  ;;  %v2092_v28 = vadd.bf16 1065369472, %v4740_v34  ;;  %v4478_v53 = vld [vmem:[#allocation12 + $0x20] sm:$0xff]   ;;  %v4483_v30 = vld [vmem:[#allocation12 + $0xe8] sm:$0xff]  }
 0x32d   : > { %v4744_v3 = vpop.eup %4743  ;;  %4757 = vrcp.bf16 %v2090_v18  ;;  %v2091_v25 = vadd.bf16 1065369472, %v4742_v40  ;;  %v4480_v23 = vld [vmem:[#allocation12 + $0xa0] sm:$0xff]   ;;  %v4482_v33 = vld [vmem:[#allocation12 + $0x28] sm:$0xff]   ;;  %v4485_v18 = vld [vmem:[#allocation12 + $0x70] sm:$0xff]  }
 0x32e   : > { %v4746_v26 = vpop.eup %4745  ;;  %4759 = vrcp.bf16 %v2092_v28  ;;  %v2093_v46 = vadd.bf16 1065369472, %v4744_v3  ;;  %v4484_v34 = vld [vmem:[#allocation12 + $0xa8] sm:$0xff]   ;;  %v4487_v40 = vld [vmem:[#allocation12 + $0xf0] sm:$0xff]   ;;  %v4495_v4 = vld [vmem:[#allocation12 + $0x1c0] sm:$0xff]  }
 0x32f   : > { %v4748_v8 = vpop.eup %4747  ;;  %4761 = vrcp.bf16 %v2091_v25  ;;  %v2137_v13 = vmul.bf16 1065369472, %v4746_v26  ;;  %v4486_v28 = vld [vmem:[#allocation12 + $0x30] sm:$0xff]   ;;  %v4489_v25 = vld [vmem:[#allocation12 + $0x78] sm:$0xff]  }
 0x330   : > { %4763 = vrcp.bf16 %v2093_v46  ;;  %v2141_v24 = vmul.bf16 1065369472, %v4748_v8  ;;  %v4750_v15 = vpop.eup %4749  ;;  %v4488_v3 = vld [vmem:[#allocation12 + $0xb0] sm:$0xff]   ;;  %v4490_v26 = vld [vmem:[#allocation12 + $0x38] sm:$0xff]   ;;  %v4493_v8 = vld [vmem:[#allocation12 + $0x140] sm:$0xff]  }
 0x331   : > { %v2211_v27 = vmul.bf16 %v2137_v13, %v5774_v58  ;;  %v4752_v44 = vpop.eup %4751  ;;  %v2159_v20 = vmul.bf16 1065369472, %v4750_v15  ;;  %v4492_v46 = vld [vmem:[#allocation12 + $0xb8] sm:$0xff]  }
 0x332   : > { %v2213_v36 = vmul.bf16 %v2141_v24, %v5778_v52  ;;  %v2163_v14 = vmul.bf16 1065369472, %v4752_v44 }
 0x333   : > { %2429 = vmatprep.subr.bf16.mxu1 %v2211_v27  ;;  %v2222_v52 = vmul.bf16 %v2159_v20, %v5785_v57 }
 0x334   : > { %2470 = vmatprep.subr.bf16.mxu0 %v2213_v36  ;;  %2430 = vmatpush1.bf16.msra.mxu1 %v2210_v38  ;;  %v2224_v22 = vmul.bf16 %v2163_v14, %v5788_v48  ;;  %v4462_v48 = vld [vmem:[#allocation12] sm:$0xff]  }
 0x335   : > { %2471 = vmatpush1.bf16.msra.mxu0 %v2212_v43 }
 0x336   : > { %v4754_v39 = vpop.eup %4753 }
 0x337   : > { %v4756_v59 = vpop.eup %4755  ;;  %v2161_v63 = vmul.bf16 1065369472, %v4754_v39 }
 0x338   : > { %v4758_v9 = vpop.eup %4757  ;;  %v2165_v1 = vmul.bf16 1065369472, %v4756_v59 }
 0x339   : > { %v4760_v58 = vpop.eup %4759  ;;  %v2223_v35 = vmul.bf16 %v2161_v63, %v5791_v60  ;;  %v2183_v16 = vmul.bf16 1065369472, %v4758_v9 }
 0x33a   : > { %v4762_v21 = vpop.eup %4761  ;;  %v2225_v37 = vmul.bf16 %v2165_v1, %v5796_v2  ;;  %v2187_v62 = vmul.bf16 1065369472, %v4760_v58 }
 0x33b   : > { %v4764_v31 = vpop.eup %4763  ;;  %2431 = vmatprep.subr.bf16.mxu1 %v2223_v35  ;;  %v2185_v56 = vmul.bf16 1065369472, %v4762_v21  ;;  %v2234_v60 = vmul.bf16 %v2183_v16, %v5804_v7  ;;  %v4466_v7 = vld [vmem:[#allocation12 + $0x8] sm:$0xff]   ;;  %v4494_v35 = vld [vmem:[#allocation12 + $0x100] sm:$0xff]  }
 0x33c   : > { %2472 = vmatprep.subr.bf16.mxu0 %v2225_v37  ;;  %2432 = vmatpush1.bf16.msra.mxu1 %v2222_v52  ;;  %v2189_v0 = vmul.bf16 1065369472, %v4764_v31  ;;  %v2236_v2 = vmul.bf16 %v2187_v62, %v5807_v6  ;;  %v4468_v6 = vld [vmem:[#allocation12 + $0x88] sm:$0xff]   ;;  %v4496_v21 = vld [vmem:[#allocation12 + $0x180] sm:$0xff]   ;;  %v4503_v62 = vld [vmem:[#allocation12 + $0x1d0] sm:$0xff]  }
 0x33d   : > { %2473 = vmatpush1.bf16.msra.mxu0 %v2224_v22  ;;  %v2235_v51 = vmul.bf16 %v2185_v56, %v5812_v54  ;;  %v4469_v54 = vld [vmem:[#allocation12 + $0x50] sm:$0xff]   ;;  %v4497_v52 = vld [vmem:[#allocation12 + $0x148] sm:$0xff]  }
 0x33e   : > { %v2237_v57 = vmul.bf16 %v2189_v0, %v5816_v32  ;;  %v4471_v32 = vld [vmem:[#allocation12 + $0xd0] sm:$0xff]   ;;  %v4499_v16 = vld [vmem:[#allocation12 + $0x1c8] sm:$0xff]  }
 0x33f   : > { %2433 = vmatprep.subr.bf16.mxu1 %v2235_v51  ;;  %v4498_v37 = vld [vmem:[#allocation12 + $0x108] sm:$0xff]   ;;  %v4501_v22 = vld [vmem:[#allocation12 + $0x150] sm:$0xff]   ;;  %v4505_v51 = vld [vmem:[#allocation12 + $0x158] sm:$0xff]  }
 0x340   : > { %2474 = vmatprep.subr.bf16.mxu0 %v2237_v57  ;;  %2434 = vmatpush1.bf16.msra.mxu1 %v2234_v60  ;;  %v4500_v31 = vld [vmem:[#allocation12 + $0x188] sm:$0xff]   ;;  %v4502_v56 = vld [vmem:[#allocation12 + $0x110] sm:$0xff]   ;;  %v4506_v60 = vld [vmem:[#allocation12 + $0x118] sm:$0xff]  }
 0x341   : > { %2475 = vmatpush1.bf16.msra.mxu0 %v2236_v2  ;;  %4036 = vmatprep.subr.bf16.mxu1 %v4461_v19  ;;  %v4504_v0 = vld [vmem:[#allocation12 + $0x190] sm:$0xff]   ;;  %v4507_v19 = vld [vmem:[#allocation12 + $0x1d8] sm:$0xff]   ;;  %v4511_v2 = vld [vmem:[#allocation12 + $0x1e0] sm:$0xff]  }
 0x342   : > { %4058 = vmatprep.subr.bf16.mxu0 %v4463_v29  ;;  %v4508_v57 = vld [vmem:[#allocation12 + $0x198] sm:$0xff]   ;;  %v4509_v29 = vld [vmem:[#allocation12 + $0x160] sm:$0xff]  }
 0x343   : > { %3926 = vmatmul.mubr.msk.bf16.vlgmr.msra.gmra.mrb[56].mxu1 %vm2259_vm2, %v5648_v12 }
 0x344   : > { %3927 = vmatmul.mubr.msk.bf16.vlgmr.msra.gmra.mrb[64].mxu0 %vm2259_vm2, %v5648_v12  ;;  %4037 = vmatpush3.bf16.msra.mxu1 %v4462_v48  ;;  %v4476_v12 = vld [vmem:[#allocation12 + $0x98] sm:$0xff]   ;;  %v4510_v48 = vld [vmem:[#allocation12 + $0x120] sm:$0xff]  }
 0x345   : > { %4059 = vmatpush3.bf16.msra.mxu0 %v4464_v61  ;;  %4038 = vmatprep.subr.bf16.mxu1 %v4465_v11  ;;  %v4512_v61 = vld [vmem:[#allocation12 + $0x1a0] sm:$0xff]   ;;  %v4513_v11 = vld [vmem:[#allocation12 + $0x168] sm:$0xff]  }
 0x346   : > { %4060 = vmatprep.subr.bf16.mxu0 %v4467_v49  ;;  %v4515_v49 = vld [vmem:[#allocation12 + $0x1e8] sm:$0xff]  }
 0x348   : > { %4039 = vmatpush3.bf16.msra.mxu1 %v4466_v7  ;;  %v4514_v7 = vld [vmem:[#allocation12 + $0x128] sm:$0xff]  }
 0x349   : > { %4061 = vmatpush3.bf16.msra.mxu0 %v4468_v6  ;;  %4040 = vmatprep.subr.bf16.mxu1 %v4469_v54  ;;  %v4516_v6 = vld [vmem:[#allocation12 + $0x1a8] sm:$0xff]   ;;  %v4517_v54 = vld [vmem:[#allocation12 + $0x170] sm:$0xff]  }
 0x34a   : > { %4062 = vmatprep.subr.bf16.mxu0 %v4471_v32  ;;  %v4519_v32 = vld [vmem:[#allocation12 + $0x1f0] sm:$0xff]  }
 0x34c   : > { %4041 = vmatpush3.bf16.msra.mxu1 %v4470_v50  ;;  %v4518_v50 = vld [vmem:[#allocation12 + $0x130] sm:$0xff]  }
 0x34d   : > { %4063 = vmatpush3.bf16.msra.mxu0 %v4472_v41  ;;  %4042 = vmatprep.subr.bf16.mxu1 %v4473_v17  ;;  %v4520_v41 = vld [vmem:[#allocation12 + $0x1b0] sm:$0xff]   ;;  %v4521_v17 = vld [vmem:[#allocation12 + $0x178] sm:$0xff]  }
 0x34e   : > { %4064 = vmatprep.subr.bf16.mxu0 %v4475_v45  ;;  %v4523_v45 = vld [vmem:[#allocation12 + $0x1f8] sm:$0xff]  }
 0x350   : > { %4043 = vmatpush3.bf16.msra.mxu1 %v4474_v47 }
 0x351   : > { %4065 = vmatpush3.bf16.msra.mxu0 %v4476_v12  ;;  %4044 = vmatprep.subr.bf16.mxu1 %v4477_v42  ;;  %v4522_v12 = vld [vmem:[#allocation12 + $0x138] sm:$0xff]  }
 0x352   : > { %4066 = vmatprep.subr.bf16.mxu0 %v4479_v10  ;;  %v4524_v42 = vld [vmem:[#allocation12 + $0x1b8] sm:$0xff]  }
 0x354   : > { %4045 = vmatpush3.bf16.msra.mxu1 %v4478_v53 }
 0x355   : > { %4067 = vmatpush3.bf16.msra.mxu0 %v4480_v23  ;;  %4046 = vmatprep.subr.bf16.mxu1 %v4481_v55  ;;  %v4525_v55 = vld [vmem:[#allocation12 + $0x240] sm:$0xff]  }
 0x356   : > { %4068 = vmatprep.subr.bf16.mxu0 %v4483_v30  ;;  %v4527_v30 = vld [vmem:[#allocation12 + $0x2c0] sm:$0xff]  }
 0x358   : > { %4047 = vmatpush3.bf16.msra.mxu1 %v4482_v33 }
 0x359   : > { %4069 = vmatpush3.bf16.msra.mxu0 %v4484_v34  ;;  %4048 = vmatprep.subr.bf16.mxu1 %v4485_v18 }
 0x35a   : > { %4070 = vmatprep.subr.bf16.mxu0 %v4487_v40 }
 0x35c   : > { %4049 = vmatpush3.bf16.msra.mxu1 %v4486_v28 }
 0x35d   : > { %4071 = vmatpush3.bf16.msra.mxu0 %v4488_v3  ;;  %4050 = vmatprep.subr.bf16.mxu1 %v4489_v25 }
 0x35e   : > { %4072 = vmatprep.subr.bf16.mxu0 %v4491_v5 }
 0x360   : > { %4051 = vmatpush3.bf16.msra.mxu1 %v4490_v26 }
 0x361   : > { %4073 = vmatpush3.bf16.msra.mxu0 %v4492_v46  ;;  %4080 = vmatprep.subr.bf16.mxu1 %v4493_v8 }
 0x362   : > { %4102 = vmatprep.subr.bf16.mxu0 %v4495_v4  ;;  %v4526_v4 = vld [vmem:[#allocation12 + $0x200] sm:$0xff]  }
 0x3d4   : > { %v2297_v13 = vpop.f32.mrb[48].mxu1 }
 0x3d5   : > { %v2548_v27 = vmul.f32 0.015625, %v2297_v13  ;;  %v2299_v38 = vpop.f32.mrb[49].mxu1 }
 0x3d6   : > { %v2338_v24 = vpop.f32.mrb[56].mxu0  ;;  %v2549_v43 = vmul.f32 0.015625, %v2299_v38  ;;  %v2301_v39 = vpop.f32.mrb[50].mxu1  ;;  %v4531_v38 = vld [vmem:[#allocation12 + $0x2c8] sm:$0xff]  }
 0x3d7   : > { %v2550_v36 = vmul.f32 0.015625, %v2338_v24  ;;  %v2340_v15 = vpop.f32.mrb[57].mxu0  ;;  %v2560_v59 = vpack.c.bf16 %v2548_v27, %v2548_v27  ;;  %v2302_v63 = vpop.f32.mrb[51].mxu1  ;;  %v4528_v24 = vld [vmem:[#allocation12 + $0x280] sm:$0xff]   ;;  %v4529_v27 = vld [vmem:[#allocation12 + $0x248] sm:$0xff]   ;;  %v4534_v39 = vld [vmem:[#allocation12 + $0x210] sm:$0xff]  }
 0x3d8   : > { %v2551_v44 = vmul.f32 0.015625, %v2340_v15  ;;  %v2342_v20 = vpop.f32.mrb[58].mxu0  ;;  %v2561_v1 = vpack.c.bf16 %v2549_v43, %v2549_v43  ;;  %v4532_v15 = vld [vmem:[#allocation12 + $0x288] sm:$0xff]   ;;  %v4533_v43 = vld [vmem:[#allocation12 + $0x250] sm:$0xff]   ;;  %v4538_v63 = vld [vmem:[#allocation12 + $0x218] sm:$0xff]  }
 0x3d9   : > { %v2562_v14 = vpack.c.bf16 %v2550_v36, %v2550_v36  ;;  %v2343_v9 = vpop.f32.mrb[59].mxu0  ;;  %v4530_v36 = vld [vmem:[#allocation12 + $0x208] sm:$0xff]   ;;  %v4536_v20 = vld [vmem:[#allocation12 + $0x290] sm:$0xff]  }
 0x3da   : > { %v2563_v58 = vpack.c.bf16 %v2551_v44, %v2551_v44  ;;  %3379 = vmatprep.mubr.bf16.mxu1 %v2561_v1  ;;  %v4535_v44 = vld [vmem:[#allocation12 + $0x2d0] sm:$0xff]   ;;  %v4540_v9 = vld [vmem:[#allocation12 + $0x298] sm:$0xff]   ;;  %v4541_v1 = vld [vmem:[#allocation12 + $0x260] sm:$0xff]  }
 0x3db   : > { %3380 = vmatmul.mubr.bf16.vlgmr.msra.gmra.mrb[60].mxu1 %v2560_v59  ;;  %v4537_v59 = vld [vmem:[#allocation12 + $0x258] sm:$0xff]  }
 0x3dc   : > { %3419 = vmatprep.mubr.bf16.mxu0 %v2563_v58  ;;  %4081 = vmatpush3.bf16.msra.mxu1 %v4494_v35  ;;  %v4543_v58 = vld [vmem:[#allocation12 + $0x2e0] sm:$0xff]  }
 0x3dd   : > { %3420 = vmatmul.mubr.bf16.vlgmr.msra.gmra.mrb[68].mxu0 %v2562_v14  ;;  %4082 = vmatprep.subr.bf16.mxu1 %v4497_v52  ;;  %v4539_v14 = vld [vmem:[#allocation12 + $0x2d8] sm:$0xff]   ;;  %v4542_v35 = vld [vmem:[#allocation12 + $0x220] sm:$0xff]   ;;  %v4545_v52 = vld [vmem:[#allocation12 + $0x268] sm:$0xff]  }
 0x3de   : > { %4103 = vmatpush3.bf16.msra.mxu0 %v4496_v21  ;;  %v4544_v21 = vld [vmem:[#allocation12 + $0x2a0] sm:$0xff]  }
 0x3df   : > { %4104 = vmatprep.subr.bf16.mxu0 %v4499_v16  ;;  %v4547_v16 = vld [vmem:[#allocation12 + $0x2e8] sm:$0xff]  }
 0x3e0   : > { %4083 = vmatpush3.bf16.msra.mxu1 %v4498_v37  ;;  %v4546_v37 = vld [vmem:[#allocation12 + $0x228] sm:$0xff]  }
 0x3e1   : > { %4084 = vmatprep.subr.bf16.mxu1 %v4501_v22  ;;  %v4549_v22 = vld [vmem:[#allocation12 + $0x270] sm:$0xff]  }
 0x3e2   : > { %4105 = vmatpush3.bf16.msra.mxu0 %v4500_v31  ;;  %v4548_v31 = vld [vmem:[#allocation12 + $0x2a8] sm:$0xff]  }
 0x3e3   : > { %4106 = vmatprep.subr.bf16.mxu0 %v4503_v62  ;;  %v4551_v62 = vld [vmem:[#allocation12 + $0x2f0] sm:$0xff]  }
 0x3e4   : > { %4085 = vmatpush3.bf16.msra.mxu1 %v4502_v56  ;;  %v4550_v56 = vld [vmem:[#allocation12 + $0x230] sm:$0xff]  }
 0x3e5   : > { %4086 = vmatprep.subr.bf16.mxu1 %v4505_v51  ;;  %v4553_v51 = vld [vmem:[#allocation12 + $0x278] sm:$0xff]  }
 0x3e6   : > { %4107 = vmatpush3.bf16.msra.mxu0 %v4504_v0  ;;  %v4552_v0 = vld [vmem:[#allocation12 + $0x2b0] sm:$0xff]  }
 0x3e7   : > { %4108 = vmatprep.subr.bf16.mxu0 %v4507_v19 }
 0x3e8   : > { %4087 = vmatpush3.bf16.msra.mxu1 %v4506_v60  ;;  %v4555_v60 = vld [vmem:[#allocation12 + $0x2f8] sm:$0xff]  }
 0x3e9   : > { %4088 = vmatprep.subr.bf16.mxu1 %v4509_v29 }
 0x3ea   : > { %4109 = vmatpush3.bf16.msra.mxu0 %v4508_v57 }
 0x3eb   : > { %4110 = vmatprep.subr.bf16.mxu0 %v4511_v2 }
 0x3ec   : > { %4089 = vmatpush3.bf16.msra.mxu1 %v4510_v48 }
 0x3ed   : > { %4090 = vmatprep.subr.bf16.mxu1 %v4513_v11 }
 0x3ee   : > { %4111 = vmatpush3.bf16.msra.mxu0 %v4512_v61 }
 0x3ef   : > { %4112 = vmatprep.subr.bf16.mxu0 %v4515_v49  ;;  %v4554_v49 = vld [vmem:[#allocation12 + $0x238] sm:$0xff]  }
 0x3f0   : > { %4091 = vmatpush3.bf16.msra.mxu1 %v4514_v7 }
 0x3f1   : > { %4092 = vmatprep.subr.bf16.mxu1 %v4517_v54 }
 0x3f2   : > { %4113 = vmatpush3.bf16.msra.mxu0 %v4516_v6 }
 0x3f3   : > { %4114 = vmatprep.subr.bf16.mxu0 %v4519_v32 }
 0x3f4   : > { %4093 = vmatpush3.bf16.msra.mxu1 %v4518_v50  ;;  %v4556_v50 = vld [vmem:[#allocation12 + $0x2b8] sm:$0xff]  }
 0x3f5   : > { %4094 = vmatprep.subr.bf16.mxu1 %v4521_v17 }
 0x3f6   : > { %4115 = vmatpush3.bf16.msra.mxu0 %v4520_v41 }
 0x3f7   : > { %4116 = vmatprep.subr.bf16.mxu0 %v4523_v45 }
 0x3f8   : > { %v2379_v47 = vpop.f32.mrb[52].mxu1  ;;  %4095 = vmatpush3.bf16.msra.mxu1 %v4522_v12 }
 0x3f9   : > { %v2552_v10 = vmul.f32 0.015625, %v2379_v47  ;;  %v2381_v53 = vpop.f32.mrb[53].mxu1  ;;  %v2420_v23 = vpop.f32.mrb[60].mxu0  ;;  %4124 = vmatprep.subr.bf16.mxu1 %v4525_v55 }
 0x3fa   : > { %v2553_v33 = vmul.f32 0.015625, %v2381_v53  ;;  %v2554_v34 = vmul.f32 0.015625, %v2420_v23  ;;  %v2422_v18 = vpop.f32.mrb[61].mxu0  ;;  %v2383_v40 = vpop.f32.mrb[54].mxu1  ;;  %4117 = vmatpush3.bf16.msra.mxu0 %v4524_v42  ;;  %v3928_v53 = vld [vmem:[#allocation14] ss:$0 sm:$0xff] }
 0x3fb   : > { %v2564_v28 = vpack.c.bf16 %v2552_v10, %v2552_v10  ;;  %v2555_v3 = vmul.f32 0.015625, %v2422_v18  ;;  %v2384_v25 = vpop.f32.mrb[55].mxu1  ;;  %v2424_v26 = vpop.f32.mrb[62].mxu0  ;;  %4146 = vmatprep.subr.bf16.mxu0 %v4527_v30 }
 0x3fc   : > { %v2565_v5 = vpack.c.bf16 %v2553_v33, %v2553_v33  ;;  %v2566_v46 = vpack.c.bf16 %v2554_v34, %v2554_v34  ;;  %v2425_v8 = vpop.f32.mrb[63].mxu0 }
 0x3fd   : > { %v2567_v13 = vpack.c.bf16 %v2555_v3, %v2555_v3 }
 0x3fe   : > { %3459 = vmatprep.mubr.bf16.mxu1 %v2565_v5 }
 0x3ff   : > { %3460 = vmatmul.mubr.bf16.vlgmr.msra.gmra.mrb[64].mxu1 %v2564_v28  ;;  %3499 = vmatprep.mubr.bf16.mxu0 %v2567_v13 }
 0x400   : > { %4125 = vmatpush3.bf16.msra.mxu1 %v4526_v4  ;;  %3500 = vmatmul.mubr.bf16.vlgmr.msra.gmra.mrb[72].mxu0 %v2566_v46 }
 0x401   : > { %4147 = vmatpush3.bf16.msra.mxu0 %v4528_v24  ;;  %4126 = vmatprep.subr.bf16.mxu1 %v4529_v27 }
 0x402   : > { %4148 = vmatprep.subr.bf16.mxu0 %v4531_v38 }
 0x404   : > { %4127 = vmatpush3.bf16.msra.mxu1 %v4530_v36 }
 0x405   : > { %4149 = vmatpush3.bf16.msra.mxu0 %v4532_v15  ;;  %4128 = vmatprep.subr.bf16.mxu1 %v4533_v43 }
 0x406   : > { %4150 = vmatprep.subr.bf16.mxu0 %v4535_v44 }
 0x408   : > { %4129 = vmatpush3.bf16.msra.mxu1 %v4534_v39 }
 0x409   : > { %4151 = vmatpush3.bf16.msra.mxu0 %v4536_v20  ;;  %4130 = vmatprep.subr.bf16.mxu1 %v4537_v59 }
 0x40a   : > { %4152 = vmatprep.subr.bf16.mxu0 %v4539_v14 }
 0x40c   : > { %4131 = vmatpush3.bf16.msra.mxu1 %v4538_v63 }
 0x40d   : > { %4153 = vmatpush3.bf16.msra.mxu0 %v4540_v9  ;;  %4132 = vmatprep.subr.bf16.mxu1 %v4541_v1 }
 0x40e   : > { %4154 = vmatprep.subr.bf16.mxu0 %v4543_v58 }
 0x410   : > { %4133 = vmatpush3.bf16.msra.mxu1 %v4542_v35 }
 0x411   : > { %4155 = vmatpush3.bf16.msra.mxu0 %v4544_v21  ;;  %4134 = vmatprep.subr.bf16.mxu1 %v4545_v52 }
 0x412   : > { %4156 = vmatprep.subr.bf16.mxu0 %v4547_v16 }
 0x414   : > { %4135 = vmatpush3.bf16.msra.mxu1 %v4546_v37 }
 0x415   : > { %4157 = vmatpush3.bf16.msra.mxu0 %v4548_v31  ;;  %4136 = vmatprep.subr.bf16.mxu1 %v4549_v22 }
 0x416   : > { %v2461_v19 = vpop.f32.mrb[56].mxu1  ;;  %4158 = vmatprep.subr.bf16.mxu0 %v4551_v62 }
 0x417   : > { %v2463_v57 = vpop.f32.mrb[57].mxu1  ;;  %v2502_v29 = vpop.f32.mrb[64].mxu0  ;;  %v2556_v7 = vmul.f32 0.015625, %v2461_v19 }
 0x418   : > { %4137 = vmatpush3.bf16.msra.mxu1 %v4550_v56  ;;  %v2557_v2 = vmul.f32 0.015625, %v2463_v57  ;;  %v2558_v48 = vmul.f32 0.015625, %v2502_v29  ;;  %v2504_v61 = vpop.f32.mrb[65].mxu0  ;;  %v2465_v11 = vpop.f32.mrb[58].mxu1 }
 0x419   : > { %4159 = vmatpush3.bf16.msra.mxu0 %v4552_v0  ;;  %v2559_v6 = vmul.f32 0.015625, %v2504_v61  ;;  %4138 = vmatprep.subr.bf16.mxu1 %v4553_v51  ;;  %v2466_v54 = vpop.f32.mrb[59].mxu1  ;;  %v2506_v32 = vpop.f32.mrb[66].mxu0  ;;  %v2568_v12 = vpack.c.bf16 %v2556_v7, %v2556_v7 }
 0x41a   : > { %v2569_v41 = vpack.c.bf16 %v2557_v2, %v2557_v2  ;;  %4160 = vmatprep.subr.bf16.mxu0 %v4555_v60  ;;  %v2507_v17 = vpop.f32.mrb[67].mxu0  ;;  %v2570_v47 = vpack.c.bf16 %v2558_v48, %v2558_v48 }
 0x41b   : > { %v2571_v45 = vpack.c.bf16 %v2559_v6, %v2559_v6 }
 0x41c   : > { %4139 = vmatpush3.bf16.msra.mxu1 %v4554_v49  ;;  %3539 = vmatprep.mubr.bf16.mxu1 %v2569_v41 }
 0x41d   : > { %4161 = vmatpush3.bf16.msra.mxu0 %v4556_v50  ;;  %3579 = vmatprep.mubr.bf16.mxu0 %v2571_v45 }
 0x41f   : > { %3540 = vmatmul.mubr.bf16.vlgmr.msra.gmra.mrb[68].mxu1 %v2568_v12 }
 0x420   : > { %3580 = vmatmul.mubr.bf16.vlgmr.msra.gmra.mrb[76].mxu0 %v2570_v47 }
 0x4ae   : > { %v4052_v42 = vpop.f32.mrb[60].mxu1 }
 0x4af   : > { %v4053_v23 = vpop.f32.mrb[61].mxu1 }
 0x4b0   : > { %v4074_v10 = vpop.f32.mrb[68].mxu0  ;;  %v4054_v30 = vadd.f32 %v4053_v23, %v4052_v42  ;;  %v4055_v33 = vpop.f32.mrb[62].mxu1 }
 0x4b1   : > { %v4075_v55 = vpop.f32.mrb[69].mxu0  ;;  %v4056_v40 = vpop.f32.mrb[63].mxu1 }
 0x4b2   : > { %v4076_v34 = vadd.f32 %v4075_v55, %v4074_v10  ;;  %v4077_v18 = vpop.f32.mrb[70].mxu0  ;;  %v3382_v3 = vadd.f32 %v4054_v30, %v3928_v53 }
 0x4b3   : > { %v4078_v28 = vpop.f32.mrb[71].mxu0 }
 0x4b4   : > { %v3422_v25 = vadd.f32 %v4076_v34, %v3382_v3 }
 0x4d2   : > { %v4096_v26 = vpop.f32.mrb[64].mxu1 }
 0x4d3   : > { %v4097_v5 = vpop.f32.mrb[65].mxu1  ;;  %v4118_v46 = vpop.f32.mrb[72].mxu0 }
 0x4d4   : > { %v4098_v8 = vadd.f32 %v4097_v5, %v4096_v26  ;;  %v4099_v4 = vpop.f32.mrb[66].mxu1  ;;  %v4119_v13 = vpop.f32.mrb[73].mxu0 }
 0x4d5   : > { %v4100_v24 = vpop.f32.mrb[67].mxu1  ;;  %v4120_v27 = vadd.f32 %v4119_v13, %v4118_v46  ;;  %v4121_v38 = vpop.f32.mrb[74].mxu0 }
 0x4d6   : > { %v3462_v36 = vadd.f32 %v4098_v8, %v3422_v25  ;;  %v4122_v15 = vpop.f32.mrb[75].mxu0 }
 0x4d8   : > { %v3502_v43 = vadd.f32 %v4120_v27, %v3462_v36 }
 0x4f2   : > { %v4140_v44 = vpop.f32.mrb[68].mxu1 }
 0x4f3   : > { %v4141_v39 = vpop.f32.mrb[69].mxu1  ;;  %v4162_v20 = vpop.f32.mrb[76].mxu0 }
 0x4f4   : > { %v4142_v59 = vadd.f32 %v4141_v39, %v4140_v44  ;;  %v4143_v14 = vpop.f32.mrb[70].mxu1  ;;  %v4163_v63 = vpop.f32.mrb[77].mxu0 }
 0x4f5   : > { %v4164_v9 = vadd.f32 %v4163_v63, %v4162_v20  ;;  %v4144_v1 = vpop.f32.mrb[71].mxu1  ;;  %v4165_v58 = vpop.f32.mrb[78].mxu0 }
 0x4f6   : > { %v3542_v35 = vadd.f32 %v4142_v59, %v3502_v43  ;;  %v4166_v21 = vpop.f32.mrb[79].mxu0 }
 0x4f8   : > { %v3582_v52 = vadd.f32 %v4164_v9, %v3542_v35 }
 0x4fa   : > { %3587 = vst [vmem:[%s393_s8] sm:$0xff] %v3582_v52 }
 0x4fb   : > { %4976 = shalt.err (!%p4973_p8)
}
 0x4fc   : > { %s4977_s23 = scalar_lea.hbm %s5855_s19, 128  ;;  %s4981_s20 = scalar_lea.hbm %s5911_s7, 256 }
 0x4fd   : > { %p4978_p1 = scmp.ne.s32.totalorder %s5855_s19, %s4977_s23  ;;  %p4982_p13 = scmp.lt.u32.totalorder %s5855_s19, %s5911_s7 }
 0x4fe   : > { %p4983_p11 = scmp.lt.u32.totalorder %s4981_s20, %s4977_s23  ;;  %p4985_p2 = scmp.lt.u32.totalorder %s4977_s23, %s5855_s19 }
 0x4ff   : > { %p4979_p3 = pnand %p4978_p1, %p5942_p9 }
 0x500   : > { %p4984_p4 = por %p4983_p11, %p4982_p13 }
 0x501   : > { %p4980_p6 = pneg %p4979_p3 }
 0x502   : > { %p4986_p10 = por %p4985_p2, %p4984_p4 }
 0x504   : > { %p4987_p12 = pnand %p4986_p10, %p4980_p6 }
 0x506   : > { %4990 = shalt.err (!%p4987_p12)
}
 0x507   : > { %4206 = dma.vmem_to_hbm [thread:$0]  (%p5942_p9), %s5857_s9, 128, %s5855_s19, %s3589_s14  }
 0x508 PF: > { %s3614_s3 = sand.u32 1, %s5037_s24   ;;  %p5943_p0 = scmp.ne.s32.totalorder %s5938_s22, 0 }
 0x509   : > { %p5944_p7 = scmp.ge.s32.totalorder %s5057_s29, 2  ;;  %s3615_s8 = scalar_lea.sflag [#allocation5], %s3614_s3 }
 0x50b   : > { %p4232_p5 = pnand %p5944_p7, %p5943_p0 }
 0x50d   : > { %5032 = dma.done.wait (!%p4232_p5), %s3615_s8, 128  }
 0x50e   : > { %5034 = vsyncadd (!%p4232_p5), %s3615_s8, 4294967168  ;;  %s26_s29 = sadd.s32 1, %s5057_s29   ;;  %s5945_s24 = smov %s5041_s25 }
 0x50f   : > { %p23_p8 = scmp.ge.s32.totalorder %s26_s29, 4   ;;  %s5946_s25 = smov %s5045_s26 }
 0x510   : > { %s5947_s26 = smov %s5345_s30  ;;  %s5948_s27 = smov %s5053_s28 }
 0x511   : > { %s5949_s28 = smov %s5951_s11  ;;  %25 = sbr.rel (!%p23_p8) target bundleno = 13 (0xd), region = 125 }
 0x518   :  { %3620 = vsyncpa [#allocation4], 1 }
 0x519   :  { %3622 = vsyncpa [#allocation4 + $0x1], 1 }
 0x51a   :  { %3623 = vsyncpa [#allocation7], 1 }
 0x51b   :  { %3624 = vsyncpa [#allocation10], 1 }
 0x51c   :  { %3625 = vsyncpa [#allocation13], 1 }
 0x51d   :  { %3626 = vsyncpa [#allocation5], 1 }
 0x51e   :  { %3628 = vsyncpa [#allocation5 + $0x1], 1 }

</bundles_post_ra>
